<compile_context>
chip_gen: v6e
topology: v6e:2x2x1
jax: 0.10.0
libtpu: 0.0.40
codegen_flags: <defaults>
</compile_context>

<pallas_src>
import functools
import math

import jax
import jax.numpy as jnp
from jax.experimental import pallas as pl
from jax.experimental.pallas import tpu as pltpu


def _gff_kernel(x_ref, w_ref, phase_ref, o_ref):
    # x_ref: (tm, F*in_dim), w_ref: (F*in_dim, F*out_dim)  [2*pi pre-folded],
    # phase_ref: (1, F*out_dim) with {0, pi/2}, o_ref: (tm, F*out_dim).
    x = x_ref[...]
    w = w_ref[...]
    if x.dtype != w.dtype:                      # e.g. fp16 x with f32 weights
        x = x.astype(w.dtype)
    z = jnp.dot(x, w, preferred_element_type=jnp.float32)
    # cos(z) = sin(z + pi/2): single transcendental over the tile.
    o_ref[...] = jnp.sin(z + phase_ref[...]).astype(o_ref.dtype)


def _round_up(x, m):
    return ((x + m - 1) // m) * m


def _choose_fold(in_dim, out_dim, *, max_weight_bytes=4 * 1024 * 1024):
    """Pick fold F: F*out_dim % 128 == 0; grow until F*in_dim >= 128 while the
    replicated (F*in_dim, F*out_dim) f32 weight stays within budget; shrink
    (losing lane-density, never correctness) if even the minimal F is too big."""
    def w_bytes(f):
        return (f * in_dim) * (f * out_dim) * 4

    f = 128 // math.gcd(out_dim, 128)
    while f * in_dim < 128 and w_bytes(2 * f) <= max_weight_bytes:
        f *= 2
    while f > 1 and w_bytes(f) > max_weight_bytes:
        f //= 2
    return max(f, 1)


def _choose_tm(n_fold, fin, fout, in_item, out_item,
               *, block_rows=None, vmem_block_budget=24 * 1024 * 1024):
    # Double-buffered input + output blocks must fit the budget.
    bytes_per_row = 2 * (fin * in_item + fout * out_item)
    tm = max(8, (vmem_block_budget // max(bytes_per_row, 1)) // 8 * 8)
    if block_rows is not None:
        tm = min(tm, _round_up(block_rows, 8))
    tm = min(tm, _round_up(n_fold, 8))
    # Keep >= 2 grid steps when there is enough work (v7x has 2 TensorCores).
    if n_fold > 8 and pl.cdiv(n_fold, tm) < 2:
        tm = max(8, _round_up(pl.cdiv(n_fold, 2), 8))
    return tm


def gaussian_fourier_features(x, weight, *, fold=None, block_rows=None):
    """x: (..., in_dim); weight: (in_dim, half). Returns (..., 2*half) =
    [sin(2*pi*x@W), cos(2*pi*x@W)]."""
    in_dim, half = weight.shape
    out_dim = 2 * half
    lead = x.shape[:-1]
    n = math.prod(lead) if lead else 1

    F = fold if fold is not None else _choose_fold(in_dim, out_dim)
    fin, fout = F * in_dim, F * out_dim

    x2 = x.reshape(n, in_dim)
    n_fold = pl.cdiv(n, F)
    n_pad = n_fold * F                       # pad at most F-1 rows
    if n_pad > n:
        x2 = jnp.concatenate(
            [x2, jnp.zeros((n_pad - n, in_dim), dtype=x2.dtype)], axis=0)
    xf = x2.reshape(n_fold, fin)

    # Block-diagonal replicated weight with 2*pi folded in (built once, small).
    w2 = (2.0 * math.pi) * jnp.concatenate([weight, weight], axis=1)
    w2 = w2.astype(jnp.float32)                                  # (in_dim, out_dim)
    wp = jnp.kron(jnp.eye(F, dtype=jnp.float32), w2)             # (fin, fout)
    if x.dtype == jnp.bfloat16:
        wp = wp.astype(jnp.bfloat16)         # native bf16 MXU path, f32 accumulate

    # Per-lane phase: 0 on the sin half of every out_dim group, pi/2 on the cos half.
    phase_row = jnp.where(jnp.arange(out_dim) < half, 0.0, 0.5 * math.pi)
    phase = jnp.tile(phase_row.astype(jnp.float32), F).reshape(1, fout)

    out_dtype = x.dtype
    in_item = jnp.dtype(x.dtype).itemsize
    out_item = jnp.dtype(out_dtype).itemsize
    tm = _choose_tm(n_fold, fin, fout, in_item, out_item, block_rows=block_rows)
    grid = (pl.cdiv(n_fold, tm),)

    w_bytes = wp.size * jnp.dtype(wp.dtype).itemsize
    blk_bytes = 2 * tm * (fin * in_item + fout * out_item)
    vmem_limit = int(min(48 * 1024 * 1024,
                         max(32 * 1024 * 1024,
                             (blk_bytes + 2 * w_bytes + 2 * phase.size * 4) * 5 // 4)))

    cost = pl.CostEstimate(
        flops=2 * n_fold * fin * fout,
        transcendentals=n_fold * fout,
        bytes_accessed=(xf.size * in_item + w_bytes + phase.size * 4
                        + n_fold * fout * out_item),
    )

    out = pl.pallas_call(
        _gff_kernel,
        out_shape=jax.ShapeDtypeStruct((n_fold, fout), out_dtype),
        grid_spec=pltpu.PrefetchScalarGridSpec(
            num_scalar_prefetch=0,
            grid=grid,
            in_specs=[
                pl.BlockSpec((tm, fin), lambda i: (i, 0)),
                pl.BlockSpec((fin, fout), lambda i: (0, 0)),   # VMEM-resident weight
                pl.BlockSpec((1, fout), lambda i: (0, 0)),     # VMEM-resident phase
            ],
            out_specs=pl.BlockSpec((tm, fout), lambda i: (i, 0)),
        ),
        compiler_params=pltpu.CompilerParams(
            dimension_semantics=("parallel",),
            vmem_limit_bytes=vmem_limit,
        ),
        cost_estimate=cost,
    )(xf, wp, phase)

    out = out.reshape(n_pad, out_dim)[:n]
    return out.reshape(*lead, out_dim)


def _reference(x, weight):
    z = 2.0 * math.pi * (x.astype(jnp.float32) @ weight.astype(jnp.float32))
    return jnp.concatenate([jnp.sin(z), jnp.cos(z)], axis=-1).astype(x.dtype)


if __name__ == "__main__":
    # Shapes consistent with the module: in_dim=4, out_dim=32, batch=2, seq=8.
    in_dim, out_dim, scale = 4, 32, 3.0
    half = out_dim // 2

    key = jax.random.PRNGKey(0)
    kx, kw, kx2, kx3 = jax.random.split(key, 4)
    weight = jax.random.normal(kw, (in_dim, half), dtype=jnp.float32) * scale

    def check(xv, tag):
        out = jax.block_until_ready(gaussian_fourier_features(xv, weight))
        ref = _reference(xv, weight)
        assert out.shape == ref.shape, (tag, out.shape, ref.shape)
        # |2*pi*x@W| reaches O(100); f32 matmul / phase rounding (~1e-7 relative)
        # therefore shows up as ~1e-5..1e-4 absolute error after sin/cos.
        err = float(jnp.max(jnp.abs(out - ref)))
        assert err < 2e-3, (tag, err)

    # batch=2, seq=8 (typical coordinate-encoding use of the module).
    check(jax.random.normal(kx, (2, 8, in_dim), dtype=jnp.float32), "base")
    # Row count not divisible by the fold factor (ragged tail handling).
    check(jax.random.normal(kx2, (3, 7, in_dim), dtype=jnp.float32), "ragged")
    # Enough rows for a multi-step grid with a partial last block.
    check(jax.random.normal(kx3, (2, 300, in_dim), dtype=jnp.float32), "multiblock")

    print("KERNEL_OK")
</pallas_src>

<mosaic_0001>
module attributes {stable_mosaic.version = 11 : i64} {
  func.func @_gff_kernel(%arg0: i32, %arg1: memref<8x128xf32, #tpu.memory_space<vmem>>, %arg2: memref<128x1024xf32, #tpu.memory_space<vmem>>, %arg3: memref<1x1024xf32, #tpu.memory_space<vmem>>, %arg4: memref<8x1024xf32, #tpu.memory_space<vmem>>) attributes {dimension_semantics = [#tpu.dimension_semantics<parallel>], iteration_bounds = array<i64: 1>, scalar_prefetch = 0 : i64, scratch_operands = 0 : i64, tpu.core_type = #tpu.core_type<tc>, window_params = [{transform_indices = @transform_0, window_bounds = array<i64: 8, 128>}, {pipeline_mode = #tpu.pipeline_mode<synchronous>, transform_indices = @transform_1, window_bounds = array<i64: 128, 1024>}, {pipeline_mode = #tpu.pipeline_mode<synchronous>, transform_indices = @transform_2, window_bounds = array<i64: 1, 1024>}, {transform_indices = @transform_3, window_bounds = array<i64: 8, 1024>}]} {
    %c0 = arith.constant 0 : index
    %c0_0 = arith.constant 0 : index
    %0 = vector.load %arg1[%c0, %c0_0] : memref<8x128xf32, #tpu.memory_space<vmem>>, vector<8x128xf32>
    %c0_1 = arith.constant 0 : index
    %c0_2 = arith.constant 0 : index
    %1 = vector.load %arg2[%c0_1, %c0_2] : memref<128x1024xf32, #tpu.memory_space<vmem>>, vector<128x1024xf32>
    %cst = arith.constant dense<0.000000e+00> : vector<8x1024xf32>
    %2 = tpu.matmul %0, %1, %cst {dimension_numbers = #tpu.dot_dimension_numbers<[1], [0], [0], [1], [0, 0, 1, 1], [], []>} : vector<8x128xf32>, vector<128x1024xf32>, vector<8x1024xf32> -> vector<8x1024xf32>
    %c0_3 = arith.constant 0 : index
    %c0_4 = arith.constant 0 : index
    %3 = vector.load %arg3[%c0_3, %c0_4] : memref<1x1024xf32, #tpu.memory_space<vmem>>, vector<1x1024xf32>
    %4 = vector.broadcast %3 : vector<1x1024xf32> to vector<8x1024xf32>
    %5 = arith.addf %2, %4 : vector<8x1024xf32>
    %6 = math.sin %5 : vector<8x1024xf32>
    %c0_5 = arith.constant 0 : index
    %c0_6 = arith.constant 0 : index
    %7 = vector.load %arg4[%c0_5, %c0_6] : memref<8x1024xf32, #tpu.memory_space<vmem>>, vector<8x1024xf32>
    tpu.vector_store %arg4[%c0_5, %c0_6], %6 {strides = array<i32>} : memref<8x1024xf32, #tpu.memory_space<vmem>>, vector<8x1024xf32>,
    return
  }
  func.func @transform_0(%arg0: i32) -> (i32, i32) {
    %c0_i32 = arith.constant 0 : i32
    %c0_i32_0 = arith.constant 0 : i32
    return %arg0, %c0_i32 : i32, i32
  }
  func.func @transform_1(%arg0: i32) -> (i32, i32) {
    %c0_i32 = arith.constant 0 : i32
    %c0_i32_0 = arith.constant 0 : i32
    %c0_i32_1 = arith.constant 0 : i32
    return %c0_i32, %c0_i32_0 : i32, i32
  }
  func.func @transform_2(%arg0: i32) -> (i32, i32) {
    %c0_i32 = arith.constant 0 : i32
    %c0_i32_0 = arith.constant 0 : i32
    %c0_i32_1 = arith.constant 0 : i32
    return %c0_i32, %c0_i32_0 : i32, i32
  }
  func.func @transform_3(%arg0: i32) -> (i32, i32) {
    %c0_i32 = arith.constant 0 : i32
    %c0_i32_0 = arith.constant 0 : i32
    return %arg0, %c0_i32 : i32, i32
  }
}

</mosaic_0001>

<bundles_post_ra>
// kernel: tpu_custom_call.1
= control target key start
LH: loop header
LB: loop body
LE: loop exit
PB: predicated region body
PF: predicated region fallthrough
CT: control target
= control target key end

     0   :  { %8 = vsyncpa [#allocation3], 0  ;;  %s2618_s0 = inlined_call_operand.hbm [shape: f32[1,128], index: 0, kind: input, shape index: {}]   ;;  %s2619_s1 = inlined_call_operand.hbm [shape: f32[128,1024], index: 1, kind: input, shape index: {}]   ;;  %s2620_s2 = inlined_call_operand.hbm [shape: f32[1,1024], index: 2, kind: input, shape index: {}]   ;;  %s2621_s3 = inlined_call_operand.hbm [shape: f32[1,1024], index: 3, kind: output, shape index: {}]  }
   0x1   :  { %9 = vsyncpa [#allocation6], 0 }
   0x2   :  { %10 = vsyncpa [#allocation4], 0 }
   0x3   :  { %15 = vsyncadd [#allocation3], 112  ;;  %s1719_s12 = smov [#allocation5]  }
   0x4   :  { %s28_s13 = sshll.u32 %s1719_s12, 4  ;;  %s29_s13 = int_to_ptr.vmem [resolvable:$true] %s28_s13 }
   0x5   :  { %s1641_s14 = scalar_lea.vmem %s29_s13, 16384  ;;  %p1646_p1 = scmp.lt.s32.totalorder %s29_s13, %s29_s13 }
   0x6   :  { %p1642_p0 = scmp.ne.s32.totalorder %s29_s13, %s1641_s14  ;;  %p1647_p2 = scmp.lt.s32.totalorder %s1641_s14, %s1641_s14 }
   0x8   :  { %p1648_p3 = por %p1647_p2, %p1646_p1 }
   0xa   :  { %p1649_p4 = pnand %p1648_p3, %p1642_p0 }
   0xc   :  { %1652 = shalt.err (!%p1649_p4)
}
   0xd   :  { %s1720_s15 = smov 1024   ;;  %s1721_s16 = smov 64  }
   0xe   :  { %34 = dma.hbm_to_vmem [thread:$0]  %s2619_s1, 16384, %s29_s13, [#allocation6], %s1720_s15, %s1720_s15, %s1721_s16  }
   0xf   :  { %s1722_s19 = smov [#allocation2]  }
  0x10   :  { %s16_s20 = sshll.u32 %s1722_s19, 4  ;;  %s17_s20 = int_to_ptr.vmem [resolvable:$true] %s16_s20 }
  0x11   :  { %s1661_s21 = scalar_lea.vmem %s17_s20, 16  ;;  %s1665_s22 = scalar_lea.vmem %s17_s20, 128 }
  0x12   :  { %p1662_p5 = scmp.ne.s32.totalorder %s17_s20, %s1661_s21  ;;  %p1666_p6 = scmp.lt.s32.totalorder %s17_s20, %s17_s20 }
  0x13   :  { %p1667_p7 = scmp.lt.s32.totalorder %s1665_s22, %s1661_s21 }
  0x15   :  { %p1668_p8 = por %p1667_p7, %p1666_p6 }
  0x17   :  { %p1669_p9 = pnand %p1668_p8, %p1662_p5 }
  0x19   :  { %1672 = shalt.err (!%p1669_p9)
}
  0x1a   :  { %s1723_s23 = smov 16   ;;  %s1724_s24 = smov 1  }
  0x1b   :  { %22 = dma.hbm_to_vmem [thread:$0]  %s2618_s0, 16, %s17_s20, [#allocation3], %s1723_s23, %s1723_s23, %s1724_s24  }
  0x1c   :  { %s1725_s27 = smov [#allocation7]  }
  0x1d   :  { %s41_s28 = sshll.u32 %s1725_s27, 4  ;;  %s42_s28 = int_to_ptr.vmem [resolvable:$true] %s41_s28 }
  0x1e   :  { %s1681_s1 = scalar_lea.vmem %s42_s28, 128  ;;  %p1686_p11 = scmp.lt.s32.totalorder %s42_s28, %s42_s28 }
  0x1f   :  { %p1682_p10 = scmp.ne.s32.totalorder %s42_s28, %s1681_s1  ;;  %p1687_p12 = scmp.lt.s32.totalorder %s1681_s1, %s1681_s1 }
  0x21   :  { %p1688_p13 = por %p1687_p12, %p1686_p11 }
  0x23   :  { %p1689_p0 = pnand %p1688_p13, %p1682_p10 }
  0x25   :  { %1692 = shalt.err (!%p1689_p0)
}
  0x26   :  { %44 = dma.hbm_to_vmem [thread:$0]  %s2620_s2, 128, %s42_s28, [#allocation6]  }
  0x27   :  { %1713 = dma.done.wait [#allocation3], 128  }
  0x28   :  { %1714 = vsyncadd [#allocation3], 4294967168 }
  0x29   :  { %1715 = dma.done.wait [#allocation6], 16512  }
  0x2a   :  { %1716 = vsyncadd [#allocation6], 4294950784  ;;  %v1726_v0 = vmov 0.0   ;;  %v176_v1 = vld [vmem:[#allocation5 + $0x3c8] sm:$0xff]  ;;  %v178_v2 = vld [vmem:[#allocation5 + $0x3d8] sm:$0xff] }
  0x2b   :  { %289 = vmatprep.mubr.f32.mxu0 %v1726_v0  ;;  %360 = vmatprep.mubr.f32.mxu1 %v1726_v0  ;;  %v175_v3 = vld [vmem:[#allocation5 + $0x3c0] sm:$0xff]  ;;  %v177_v4 = vld [vmem:[#allocation5 + $0x3d0] sm:$0xff]  ;;  %v168_v5 = vld [vmem:[#allocation5 + $0x388] sm:$0xff] }
  0x2c   :  { %225 = vmatprep.subr.mxu0 %v176_v1  ;;  %296 = vmatprep.subr.mxu1 %v178_v2  ;;  %v170_v6 = vld [vmem:[#allocation5 + $0x398] sm:$0xff]  ;;  %v167_v7 = vld [vmem:[#allocation5 + $0x380] sm:$0xff]  ;;  %v169_v8 = vld [vmem:[#allocation5 + $0x390] sm:$0xff] }
  0x2d   :  { %226 = vmatpush1.msra.mxu0 %v175_v3  ;;  %297 = vmatpush1.msra.mxu1 %v177_v4  ;;  %v160_v9 = vld [vmem:[#allocation5 + $0x348] sm:$0xff]  ;;  %v162_v10 = vld [vmem:[#allocation5 + $0x358] sm:$0xff]  ;;  %v159_v11 = vld [vmem:[#allocation5 + $0x340] sm:$0xff] }
  0x2e   :  { %227 = vmatprep.subr.mxu0 %v168_v5  ;;  %298 = vmatprep.subr.mxu1 %v170_v6  ;;  %v161_v12 = vld [vmem:[#allocation5 + $0x350] sm:$0xff]  ;;  %v152_v13 = vld [vmem:[#allocation5 + $0x308] sm:$0xff]  ;;  %v154_v14 = vld [vmem:[#allocation5 + $0x318] sm:$0xff] }
  0x2f   :  { %228 = vmatpush1.msra.mxu0 %v167_v7  ;;  %299 = vmatpush1.msra.mxu1 %v169_v8  ;;  %v151_v15 = vld [vmem:[#allocation5 + $0x300] sm:$0xff]  ;;  %v153_v16 = vld [vmem:[#allocation5 + $0x310] sm:$0xff]  ;;  %v144_v17 = vld [vmem:[#allocation5 + $0x2c8] sm:$0xff] }
  0x30   :  { %229 = vmatprep.subr.mxu0 %v160_v9  ;;  %300 = vmatprep.subr.mxu1 %v162_v10  ;;  %v146_v18 = vld [vmem:[#allocation5 + $0x2d8] sm:$0xff]  ;;  %v143_v19 = vld [vmem:[#allocation5 + $0x2c0] sm:$0xff]  ;;  %v145_v20 = vld [vmem:[#allocation5 + $0x2d0] sm:$0xff] }
  0x31   :  { %230 = vmatpush1.msra.mxu0 %v159_v11  ;;  %301 = vmatpush1.msra.mxu1 %v161_v12  ;;  %v136_v21 = vld [vmem:[#allocation5 + $0x288] sm:$0xff]  ;;  %v138_v22 = vld [vmem:[#allocation5 + $0x298] sm:$0xff]  ;;  %v135_v23 = vld [vmem:[#allocation5 + $0x280] sm:$0xff] }
  0x32   :  { %231 = vmatprep.subr.mxu0 %v152_v13  ;;  %302 = vmatprep.subr.mxu1 %v154_v14  ;;  %v137_v24 = vld [vmem:[#allocation5 + $0x290] sm:$0xff]  ;;  %v128_v25 = vld [vmem:[#allocation5 + $0x248] sm:$0xff]  ;;  %v130_v26 = vld [vmem:[#allocation5 + $0x258] sm:$0xff] }
  0x33   :  { %232 = vmatpush1.msra.mxu0 %v151_v15  ;;  %303 = vmatpush1.msra.mxu1 %v153_v16  ;;  %v127_v27 = vld [vmem:[#allocation5 + $0x240] sm:$0xff]  ;;  %v129_v28 = vld [vmem:[#allocation5 + $0x250] sm:$0xff]  ;;  %v120_v29 = vld [vmem:[#allocation5 + $0x208] sm:$0xff] }
  0x34   :  { %233 = vmatprep.subr.mxu0 %v144_v17  ;;  %304 = vmatprep.subr.mxu1 %v146_v18  ;;  %v122_v30 = vld [vmem:[#allocation5 + $0x218] sm:$0xff]  ;;  %v119_v31 = vld [vmem:[#allocation5 + $0x200] sm:$0xff]  ;;  %v121_v32 = vld [vmem:[#allocation5 + $0x210] sm:$0xff] }
  0x35   :  { %234 = vmatpush1.msra.mxu0 %v143_v19  ;;  %305 = vmatpush1.msra.mxu1 %v145_v20  ;;  %v112_v33 = vld [vmem:[#allocation5 + $0x1c8] sm:$0xff]  ;;  %v114_v34 = vld [vmem:[#allocation5 + $0x1d8] sm:$0xff]  ;;  %v111_v35 = vld [vmem:[#allocation5 + $0x1c0] sm:$0xff] }
  0x36   :  { %235 = vmatprep.subr.mxu0 %v136_v21  ;;  %306 = vmatprep.subr.mxu1 %v138_v22  ;;  %v113_v36 = vld [vmem:[#allocation5 + $0x1d0] sm:$0xff]  ;;  %v104_v37 = vld [vmem:[#allocation5 + $0x188] sm:$0xff]  ;;  %v106_v38 = vld [vmem:[#allocation5 + $0x198] sm:$0xff] }
  0x37   :  { %236 = vmatpush1.msra.mxu0 %v135_v23  ;;  %307 = vmatpush1.msra.mxu1 %v137_v24  ;;  %v103_v39 = vld [vmem:[#allocation5 + $0x180] sm:$0xff]  ;;  %v105_v40 = vld [vmem:[#allocation5 + $0x190] sm:$0xff]  ;;  %v96_v41 = vld [vmem:[#allocation5 + $0x148] sm:$0xff] }
  0x38   :  { %237 = vmatprep.subr.mxu0 %v128_v25  ;;  %308 = vmatprep.subr.mxu1 %v130_v26  ;;  %v98_v42 = vld [vmem:[#allocation5 + $0x158] sm:$0xff]  ;;  %v95_v43 = vld [vmem:[#allocation5 + $0x140] sm:$0xff]  ;;  %v97_v44 = vld [vmem:[#allocation5 + $0x150] sm:$0xff] }
  0x39   :  { %238 = vmatpush1.msra.mxu0 %v127_v27  ;;  %309 = vmatpush1.msra.mxu1 %v129_v28  ;;  %v88_v45 = vld [vmem:[#allocation5 + $0x108] sm:$0xff]  ;;  %v90_v46 = vld [vmem:[#allocation5 + $0x118] sm:$0xff]  ;;  %v87_v47 = vld [vmem:[#allocation5 + $0x100] sm:$0xff] }
  0x3a   :  { %239 = vmatprep.subr.mxu0 %v120_v29  ;;  %310 = vmatprep.subr.mxu1 %v122_v30  ;;  %v89_v48 = vld [vmem:[#allocation5 + $0x110] sm:$0xff]  ;;  %v80_v49 = vld [vmem:[#allocation5 + $0xc8] sm:$0xff]  ;;  %v82_v50 = vld [vmem:[#allocation5 + $0xd8] sm:$0xff] }
  0x3b   :  { %240 = vmatpush1.msra.mxu0 %v119_v31  ;;  %311 = vmatpush1.msra.mxu1 %v121_v32  ;;  %v79_v51 = vld [vmem:[#allocation5 + $0xc0] sm:$0xff]  ;;  %v81_v52 = vld [vmem:[#allocation5 + $0xd0] sm:$0xff]  ;;  %v72_v53 = vld [vmem:[#allocation5 + $0x88] sm:$0xff] }
  0x3c   :  { %241 = vmatprep.subr.mxu0 %v112_v33  ;;  %312 = vmatprep.subr.mxu1 %v114_v34  ;;  %v74_v54 = vld [vmem:[#allocation5 + $0x98] sm:$0xff]  ;;  %v71_v55 = vld [vmem:[#allocation5 + $0x80] sm:$0xff]  ;;  %v73_v56 = vld [vmem:[#allocation5 + $0x90] sm:$0xff] }
  0x3d   :  { %242 = vmatpush1.msra.mxu0 %v111_v35  ;;  %313 = vmatpush1.msra.mxu1 %v113_v36  ;;  %v64_v57 = vld [vmem:[#allocation5 + $0x48] sm:$0xff]  ;;  %v66_v58 = vld [vmem:[#allocation5 + $0x58] sm:$0xff]  ;;  %v63_v59 = vld [vmem:[#allocation5 + $0x40] sm:$0xff] }
  0x3e   :  { %243 = vmatprep.subr.mxu0 %v104_v37  ;;  %314 = vmatprep.subr.mxu1 %v106_v38  ;;  %v65_v60 = vld [vmem:[#allocation5 + $0x50] sm:$0xff]  ;;  %v56_v61 = vld [vmem:[#allocation5 + $0x8] sm:$0xff]  ;;  %v58_v62 = vld [vmem:[#allocation5 + $0x18] sm:$0xff] }
  0x3f   :  { %244 = vmatpush1.msra.mxu0 %v103_v39  ;;  %315 = vmatpush1.msra.mxu1 %v105_v40  ;;  %v55_v63 = vld [vmem:[#allocation5] sm:$0xff]  ;;  %v57_v1 = vld [vmem:[#allocation5 + $0x10] sm:$0xff]  ;;  %v1768_v2 = vld [vmem:[#allocation2] sm:$0xff] }
  0x40   :  { %245 = vmatprep.subr.mxu0 %v96_v41  ;;  %316 = vmatprep.subr.mxu1 %v98_v42  ;;  %v180_v3 = vld [vmem:[#allocation5 + $0x3e8] sm:$0xff]  ;;  %v182_v4 = vld [vmem:[#allocation5 + $0x3f8] sm:$0xff]  ;;  %v179_v5 = vld [vmem:[#allocation5 + $0x3e0] sm:$0xff] }
  0x41   :  { %246 = vmatpush1.msra.mxu0 %v95_v43  ;;  %317 = vmatpush1.msra.mxu1 %v97_v44  ;;  %v181_v6 = vld [vmem:[#allocation5 + $0x3f0] sm:$0xff]  ;;  %v172_v7 = vld [vmem:[#allocation5 + $0x3a8] sm:$0xff]  ;;  %v174_v8 = vld [vmem:[#allocation5 + $0x3b8] sm:$0xff] }
  0x42   :  { %247 = vmatprep.subr.mxu0 %v88_v45  ;;  %318 = vmatprep.subr.mxu1 %v90_v46  ;;  %v171_v9 = vld [vmem:[#allocation5 + $0x3a0] sm:$0xff]  ;;  %v173_v10 = vld [vmem:[#allocation5 + $0x3b0] sm:$0xff]  ;;  %v164_v11 = vld [vmem:[#allocation5 + $0x368] sm:$0xff] }
  0x43   :  { %248 = vmatpush1.msra.mxu0 %v87_v47  ;;  %319 = vmatpush1.msra.mxu1 %v89_v48  ;;  %v166_v12 = vld [vmem:[#allocation5 + $0x378] sm:$0xff]  ;;  %v163_v13 = vld [vmem:[#allocation5 + $0x360] sm:$0xff]  ;;  %v165_v14 = vld [vmem:[#allocation5 + $0x370] sm:$0xff] }
  0x44   :  { %249 = vmatprep.subr.mxu0 %v80_v49  ;;  %320 = vmatprep.subr.mxu1 %v82_v50  ;;  %v156_v15 = vld [vmem:[#allocation5 + $0x328] sm:$0xff]  ;;  %v158_v16 = vld [vmem:[#allocation5 + $0x338] sm:$0xff]  ;;  %v155_v17 = vld [vmem:[#allocation5 + $0x320] sm:$0xff] }
  0x45   :  { %250 = vmatpush1.msra.mxu0 %v79_v51  ;;  %321 = vmatpush1.msra.mxu1 %v81_v52  ;;  %v157_v18 = vld [vmem:[#allocation5 + $0x330] sm:$0xff]  ;;  %v148_v19 = vld [vmem:[#allocation5 + $0x2e8] sm:$0xff]  ;;  %v150_v20 = vld [vmem:[#allocation5 + $0x2f8] sm:$0xff] }
  0x46   :  { %251 = vmatprep.subr.mxu0 %v72_v53  ;;  %322 = vmatprep.subr.mxu1 %v74_v54  ;;  %v147_v21 = vld [vmem:[#allocation5 + $0x2e0] sm:$0xff]  ;;  %v149_v22 = vld [vmem:[#allocation5 + $0x2f0] sm:$0xff]  ;;  %v140_v23 = vld [vmem:[#allocation5 + $0x2a8] sm:$0xff] }
  0x47   :  { %252 = vmatpush1.msra.mxu0 %v71_v55  ;;  %323 = vmatpush1.msra.mxu1 %v73_v56  ;;  %v142_v24 = vld [vmem:[#allocation5 + $0x2b8] sm:$0xff]  ;;  %v139_v25 = vld [vmem:[#allocation5 + $0x2a0] sm:$0xff]  ;;  %v141_v26 = vld [vmem:[#allocation5 + $0x2b0] sm:$0xff] }
  0x48   :  { %253 = vmatprep.subr.mxu0 %v64_v57  ;;  %324 = vmatprep.subr.mxu1 %v66_v58  ;;  %v132_v27 = vld [vmem:[#allocation5 + $0x268] sm:$0xff]  ;;  %v134_v28 = vld [vmem:[#allocation5 + $0x278] sm:$0xff]  ;;  %v131_v29 = vld [vmem:[#allocation5 + $0x260] sm:$0xff] }
  0x49   :  { %254 = vmatpush1.msra.mxu0 %v63_v59  ;;  %325 = vmatpush1.msra.mxu1 %v65_v60  ;;  %v133_v30 = vld [vmem:[#allocation5 + $0x270] sm:$0xff]  ;;  %v124_v31 = vld [vmem:[#allocation5 + $0x228] sm:$0xff]  ;;  %v126_v32 = vld [vmem:[#allocation5 + $0x238] sm:$0xff] }
  0x4a   :  { %255 = vmatprep.subr.mxu0 %v56_v61  ;;  %326 = vmatprep.subr.mxu1 %v58_v62  ;;  %v123_v33 = vld [vmem:[#allocation5 + $0x220] sm:$0xff]  ;;  %v125_v34 = vld [vmem:[#allocation5 + $0x230] sm:$0xff]  ;;  %v116_v35 = vld [vmem:[#allocation5 + $0x1e8] sm:$0xff] }
  0x4b   :  { %256 = vmatpush1.msra.mxu0 %v55_v63  ;;  %327 = vmatpush1.msra.mxu1 %v57_v1  ;;  %v118_v36 = vld [vmem:[#allocation5 + $0x1f8] sm:$0xff]  ;;  %v115_v37 = vld [vmem:[#allocation5 + $0x1e0] sm:$0xff]  ;;  %v117_v38 = vld [vmem:[#allocation5 + $0x1f0] sm:$0xff] }
  0x4c   :  { %290 = vmatmul.mubr.f32.vlgmr.msra.gmra.mxu0 %v1768_v2  ;;  %361 = vmatmul.mubr.f32.vlgmr.msra.gmra.mxu1 %v1768_v2  ;;  %v108_v39 = vld [vmem:[#allocation5 + $0x1a8] sm:$0xff]  ;;  %v110_v40 = vld [vmem:[#allocation5 + $0x1b8] sm:$0xff]  ;;  %v107_v41 = vld [vmem:[#allocation5 + $0x1a0] sm:$0xff] }
  0x4d   :  { %367 = vmatprep.subr.mxu0 %v180_v3  ;;  %438 = vmatprep.subr.mxu1 %v182_v4  ;;  %v109_v42 = vld [vmem:[#allocation5 + $0x1b0] sm:$0xff]  ;;  %v100_v43 = vld [vmem:[#allocation5 + $0x168] sm:$0xff]  ;;  %v102_v44 = vld [vmem:[#allocation5 + $0x178] sm:$0xff] }
  0x4e   :  { %368 = vmatpush1.msra.mxu0 %v179_v5  ;;  %439 = vmatpush1.msra.mxu1 %v181_v6  ;;  %v99_v45 = vld [vmem:[#allocation5 + $0x160] sm:$0xff]  ;;  %v101_v46 = vld [vmem:[#allocation5 + $0x170] sm:$0xff]  ;;  %v92_v47 = vld [vmem:[#allocation5 + $0x128] sm:$0xff]  ;;  %v185_v5 = vlaneseq }
  0x4f   :  { %369 = vmatprep.subr.mxu0 %v172_v7  ;;  %440 = vmatprep.subr.mxu1 %v174_v8  ;;  %v94_v48 = vld [vmem:[#allocation5 + $0x138] sm:$0xff]  ;;  %v91_v49 = vld [vmem:[#allocation5 + $0x120] sm:$0xff]  ;;  %v93_v50 = vld [vmem:[#allocation5 + $0x130] sm:$0xff] }
  0x50   :  { %370 = vmatpush1.msra.mxu0 %v171_v9  ;;  %441 = vmatpush1.msra.mxu1 %v173_v10  ;;  %v84_v51 = vld [vmem:[#allocation5 + $0xe8] sm:$0xff]  ;;  %v86_v52 = vld [vmem:[#allocation5 + $0xf8] sm:$0xff]  ;;  %v83_v53 = vld [vmem:[#allocation5 + $0xe0] sm:$0xff]  ;;  %v1776_v6 = vshrl.u32 %v185_v5, 7 }
  0x51   :  { %371 = vmatprep.subr.mxu0 %v164_v11  ;;  %442 = vmatprep.subr.mxu1 %v166_v12  ;;  %v85_v54 = vld [vmem:[#allocation5 + $0xf0] sm:$0xff]  ;;  %v76_v55 = vld [vmem:[#allocation5 + $0xa8] sm:$0xff]  ;;  %v78_v56 = vld [vmem:[#allocation5 + $0xb8] sm:$0xff] }
  0x52   :  { %372 = vmatpush1.msra.mxu0 %v163_v13  ;;  %443 = vmatpush1.msra.mxu1 %v165_v14  ;;  %v75_v57 = vld [vmem:[#allocation5 + $0xa0] sm:$0xff]  ;;  %v77_v58 = vld [vmem:[#allocation5 + $0xb0] sm:$0xff]  ;;  %v68_v59 = vld [vmem:[#allocation5 + $0x68] sm:$0xff]  ;;  %v187_v7 = vsub.s32 0, %v1776_v6 }
  0x53   :  { %373 = vmatprep.subr.mxu0 %v156_v15  ;;  %444 = vmatprep.subr.mxu1 %v158_v16  ;;  %v70_v60 = vld [vmem:[#allocation5 + $0x78] sm:$0xff]  ;;  %v67_v61 = vld [vmem:[#allocation5 + $0x60] sm:$0xff]  ;;  %v69_v62 = vld [vmem:[#allocation5 + $0x70] sm:$0xff] }
  0x54   :  { %374 = vmatpush1.msra.mxu0 %v155_v17  ;;  %445 = vmatpush1.msra.mxu1 %v157_v18  ;;  %v60_v63 = vld [vmem:[#allocation5 + $0x28] sm:$0xff]  ;;  %v62_v1 = vld [vmem:[#allocation5 + $0x38] sm:$0xff]  ;;  %v59_v3 = vld [vmem:[#allocation5 + $0x20] sm:$0xff] }
  0x55   :  { %375 = vmatprep.subr.mxu0 %v148_v19  ;;  %446 = vmatprep.subr.mxu1 %v150_v20  ;;  %v61_v4 = vld [vmem:[#allocation5 + $0x30] sm:$0xff]  ;;  %v1779_v8 = vld [vmem:[#allocation7] sm:$0xff] }
  0x56   :  { %376 = vmatpush1.msra.mxu0 %v147_v21  ;;  %447 = vmatpush1.msra.mxu1 %v149_v22  ;;  %v188_v9 = vrot.slane %v1779_v8, %v187_v7  ;;  %v191_v21 = vsub.s32 1, %v1776_v6 }
  0x57   :  { %377 = vmatprep.subr.mxu0 %v140_v23  ;;  %448 = vmatprep.subr.mxu1 %v142_v24 }
  0x58   :  { %378 = vmatpush1.msra.mxu0 %v139_v25  ;;  %449 = vmatpush1.msra.mxu1 %v141_v26  ;;  %v192_v24 = vrot.slane %v1779_v8, %v191_v21 }
  0x59   :  { %379 = vmatprep.subr.mxu0 %v132_v27  ;;  %450 = vmatprep.subr.mxu1 %v134_v28 }
  0x5a   :  { %380 = vmatpush1.msra.mxu0 %v131_v29  ;;  %451 = vmatpush1.msra.mxu1 %v133_v30  ;;  %v2641_v29 = vmov 1326507024  }
  0x5b   :  { %381 = vmatprep.subr.mxu0 %v124_v31  ;;  %452 = vmatprep.subr.mxu1 %v126_v32  ;;  %v199_v31 = vsub.s32 3, %v1776_v6  ;;  %v1728_v32 = vmov 920167782  }
  0x5c   :  { %382 = vmatpush1.msra.mxu0 %v123_v33  ;;  %453 = vmatpush1.msra.mxu1 %v125_v34 }
  0x5d   :  { %383 = vmatprep.subr.mxu0 %v116_v35  ;;  %454 = vmatprep.subr.mxu1 %v118_v36 }
  0x5e   :  { %384 = vmatpush1.msra.mxu0 %v115_v37  ;;  %455 = vmatpush1.msra.mxu1 %v117_v38  ;;  %v2635_v38 = vmov 2131351028  }
  0x5f   :  { %385 = vmatprep.subr.mxu0 %v108_v39  ;;  %456 = vmatprep.subr.mxu1 %v110_v40  ;;  %v2637_v40 = vmov 2102212464  }
  0x60   :  { %386 = vmatpush1.msra.mxu0 %v107_v41  ;;  %457 = vmatpush1.msra.mxu1 %v109_v42 }
  0x61   :  { %387 = vmatprep.subr.mxu0 %v100_v43  ;;  %458 = vmatprep.subr.mxu1 %v102_v44  ;;  %v2631_v43 = vmov 2475754826  }
  0x62   :  { %388 = vmatpush1.msra.mxu0 %v99_v45  ;;  %459 = vmatpush1.msra.mxu1 %v101_v46  ;;  %v200_v46 = vrot.slane %v1779_v8, %v199_v31 }
  0x63   :  { %389 = vmatprep.subr.mxu0 %v92_v47  ;;  %460 = vmatprep.subr.mxu1 %v94_v48 }
  0x64   :  { %390 = vmatpush1.msra.mxu0 %v91_v49  ;;  %461 = vmatpush1.msra.mxu1 %v93_v50 }
  0x65   :  { %391 = vmatprep.subr.mxu0 %v84_v51  ;;  %462 = vmatprep.subr.mxu1 %v86_v52  ;;  %v2629_v52 = vmov 683565275  }
  0x66   :  { %392 = vmatpush1.msra.mxu0 %v83_v53  ;;  %463 = vmatpush1.msra.mxu1 %v85_v54 }
  0x67   :  { %393 = vmatprep.subr.mxu0 %v76_v55  ;;  %464 = vmatprep.subr.mxu1 %v78_v56 }
  0x68   :  { %394 = vmatpush1.msra.mxu0 %v75_v57  ;;  %465 = vmatpush1.msra.mxu1 %v77_v58 }
  0x69   :  { %395 = vmatprep.subr.mxu0 %v68_v59  ;;  %466 = vmatprep.subr.mxu1 %v70_v60 }
  0x6a   :  { %396 = vmatpush1.msra.mxu0 %v67_v61  ;;  %467 = vmatpush1.msra.mxu1 %v69_v62 }
  0x6b   :  { %397 = vmatprep.subr.mxu0 %v60_v63  ;;  %468 = vmatprep.subr.mxu1 %v62_v1 }
  0x6c   :  { %398 = vmatpush1.msra.mxu0 %v59_v3  ;;  %431 = vmatprep.mubr.f32.mxu0 %v1726_v0 }
  0x6d   :  { %469 = vmatpush1.msra.mxu1 %v61_v4  ;;  %502 = vmatprep.mubr.f32.mxu1 %v1726_v0  ;;  %v195_v0 = vsub.s32 2, %v1776_v6 }
  0x6e   :  { %432 = vmatmul.mubr.f32.vlgmr.msra.gmra.mxu0 %v1768_v2  ;;  %503 = vmatmul.mubr.f32.vlgmr.msra.gmra.mxu1 %v1768_v2 }
  0x6f   :  { %v196_v2 = vrot.slane %v1779_v8, %v195_v0 }
 0x10c   :  { %v291_v10 = vpop.f32.mrf.mxu0  ;;  %v362_v15 = vpop.f32.mrf.mxu1 }
 0x10d   :  { %v1782_v11 = vadd.f32 %v291_v10, %v188_v9  ;;  %v1787_v17 = vadd.f32 %v362_v15, %v196_v2 }
 0x10e   :  { %v293_v25 = vpop.f32.mrf.mxu0  ;;  %v364_v54 = vpop.f32.mrf.mxu1 }
 0x10f   :  { %v512_v12 = vand.u32 2139095040, %v1782_v11  ;;  %v720_v18 = vand.u32 2139095040, %v1787_v17  ;;  %v1794_v28 = vadd.f32 %v293_v25, %v192_v24  ;;  %v2627_v34 = vand.u32 2147483647, %v1782_v11 }
 0x110   :  { %v1824_v62 = vadd.f32 %v364_v54, %v200_v46  ;;  %v2626_v2 = vand.u32 2147483647, %v1787_v17 }
 0x111   :  { %v513_v13 = vshrl.u32 %v512_v12, 23  ;;  %v721_v20 = vshrl.u32 %v720_v18, 23  ;;  %v616_v36 = vand.u32 2139095040, %v1794_v28  ;;  %v516_v51 = vand.u32 8388607, %v2627_v34 }
 0x112   :  { %v824_v10 = vand.u32 2139095040, %v1824_v62  ;;  %v724_v46 = vand.u32 8388607, %v2626_v2 }
 0x113   :  { %v1519_v14 = vadd.s32 4294967169, %v513_v13  ;;  %v1527_v23 = vadd.s32 4294967169, %v721_v20  ;;  %v617_v57 = vshrl.u32 %v616_v36, 23  ;;  %v517_v63 = vor.u32 8388608, %v516_v51 }
 0x114   :  { %v825_v21 = vshrl.u32 %v824_v10, 23 }
 0x115   :  { %v519_v16 = vadd.s32 1, %v1519_v14  ;;  %v727_v27 = vadd.s32 1, %v1527_v23  ;;  %v1523_v4 = vadd.s32 4294967169, %v617_v57  ;;  %v1842_v0 = vshll.u32 %v517_v63, 8 }
 0x117   :  { %vm520_vm0 = vcmp.gt.s32.totalorder %v519_v16, 0  ;;  %vm728_vm1 = vcmp.gt.s32.totalorder %v727_v27, 0  ;;  %v623_v14 = vadd.s32 1, %v1523_v4  ;;  %v2625_v4 = vand.u32 2147483647, %v1794_v28 }
 0x118   :  { %v521_v19 = vsel %vm520_vm0, %v519_v16, 0  ;;  %v729_v50 = vsel %vm728_vm1, %v727_v27, 0 }
 0x119   :  { %v523_v22 = vand.u32 31, %v521_v19  ;;  %v1804_v37 = vshrl.u32 %v521_v19, 5  ;;  %v731_v60 = vand.u32 31, %v729_v50  ;;  %v1845_v15 = vshrl.u32 %v729_v50, 5 }
 0x11a   :  { %vm624_vm6 = vcmp.gt.s32.totalorder %v623_v14, 0 }
 0x11b   :  { %v1792_v26 = vsub.s32 32, %v523_v22  ;;  %v538_v35 = vshll.u32 %v1728_v32, %v523_v22  ;;  %v535_v42 = vshll.u32 %v2637_v40, %v523_v22  ;;  %v529_v47 = vshll.u32 %v2631_v43, %v523_v22 }
 0x11c   :  { %v532_v48 = vshll.u32 %v2635_v38, %v523_v22  ;;  %v526_v53 = vshll.u32 %v2629_v52, %v523_v22  ;;  %vm544_vm2 = vcmp.lt.s32.totalorder %v1804_v37, 4  ;;  %vm541_vm3 = vcmp.lt.s32.totalorder %v1804_v37, 1 }
 0x11d   :  { %v539_v30 = vshrl.u32 %v2641_v29, %v1792_v26  ;;  %v536_v33 = vshrl.u32 %v1728_v32, %v1792_v26  ;;  %v530_v39 = vshrl.u32 %v2635_v38, %v1792_v26  ;;  %v533_v41 = vshrl.u32 %v2637_v40, %v1792_v26 }
 0x11e   :  { %v527_v44 = vshrl.u32 %v2631_v43, %v1792_v26  ;;  %vm543_vm4 = vcmp.lt.s32.totalorder %v1804_v37, 3  ;;  %v732_v9 = vsub.s32 32, %v731_v60  ;;  %vm542_vm5 = vcmp.lt.s32.totalorder %v1804_v37, 2 }
 0x11f   :  { %v540_v45 = vor.u32 %v539_v30, %v538_v35  ;;  %v537_v49 = vor.u32 %v536_v33, %v535_v42  ;;  %v531_v55 = vor.u32 %v530_v39, %v529_v47  ;;  %v534_v56 = vor.u32 %v533_v41, %v532_v48 }
 0x120   :  { %v528_v58 = vor.u32 %v527_v44, %v526_v53  ;;  %v744_v16 = vshrl.u32 %v1728_v32, %v732_v9  ;;  %v747_v20 = vshrl.u32 %v2641_v29, %v732_v9  ;;  %v735_v24 = vshrl.u32 %v2631_v43, %v732_v9 }
 0x121   :  { %v554_v59 = vsel %vm544_vm2, %v540_v45, 1326507024  ;;  %v550_v61 = vsel %vm544_vm2, %v537_v49, 920167782  ;;  %v553_v1 = vsel %vm541_vm3, %v531_v55, %v534_v56  ;;  %v743_v25 = vshll.u32 %v2637_v40, %v731_v60 }
 0x122   :  { %v555_v3 = vsel %vm543_vm4, %v537_v49, %v554_v59  ;;  %v549_v5 = vsel %vm541_vm3, %v528_v58, %v531_v55  ;;  %v551_v7 = vsel %vm543_vm4, %v534_v56, %v550_v61  ;;  %v738_v27 = vshrl.u32 %v2635_v38, %v732_v9 }
 0x123   :  { %v556_v12 = vsel %vm542_vm5, %v553_v1, %v555_v3  ;;  %v552_v13 = vsel %vm542_vm5, %v549_v5, %v551_v7  ;;  %v741_v30 = vshrl.u32 %v2637_v40, %v732_v9  ;;  %v746_v31 = vshll.u32 %v1728_v32, %v731_v60 }
 0x124   :  { %v1849_v18 = vmul.u32.u64.low %v1842_v0, %v556_v12  ;;  %v1850_v19 = vmul.u32.u64.high %v1842_v0, %v556_v12, %v1849_v18  ;;  %v1854_v22 = vmul.u32.u64.low %v1842_v0, %v552_v13  ;;  %v1855_v23 = vmul.u32.u64.high %v1842_v0, %v552_v13, %v1854_v22 }
 0x125   :  { %v734_v33 = vshll.u32 %v2629_v52, %v731_v60  ;;  %v745_v35 = vor.u32 %v744_v16, %v743_v25  ;;  %v737_v36 = vshll.u32 %v2631_v43, %v731_v60  ;;  %v740_v39 = vshll.u32 %v2635_v38, %v731_v60 }
 0x126   :  { %v748_v41 = vor.u32 %v747_v20, %v746_v31  ;;  %v1531_v42 = vadd.s32 4294967169, %v825_v21  ;;  %v525_v44 = vshrl.u32 %v2629_v52, %v1792_v26  ;;  %v546_v45 = vsel %vm544_vm2, %v534_v56, 2102212464 }
 0x127   :  { %v625_v47 = vsel %vm624_vm6, %v623_v14, 0  ;;  %v736_v48 = vor.u32 %v735_v24, %v734_v33  ;;  %v739_v49 = vor.u32 %v738_v27, %v737_v36  ;;  %v742_v50 = vor.u32 %v741_v30, %v740_v39 }
 0x128   :  { %vm752_vm7 = vcmp.lt.s32.totalorder %v1845_v15, 4  ;;  %v545_v51 = vsel %vm541_vm3, %v525_v44, %v528_v58  ;;  %v547_v26 = vsel %vm543_vm4, %v531_v55, %v546_v45  ;;  %v627_v56 = vand.u32 31, %v625_v47 }
 0x129   :  { %v758_v53 = vsel %vm752_vm7, %v745_v35, 920167782  ;;  %v762_v54 = vsel %vm752_vm7, %v748_v41, 1326507024  ;;  %v831_v57 = vadd.s32 1, %v1531_v42  ;;  %v567_v59 = vadd.s32 1, %v1855_v23 }
 0x12a   :  { %vm749_vm8 = vcmp.lt.s32.totalorder %v1845_v15, 1  ;;  %vm751_vm9 = vcmp.lt.s32.totalorder %v1845_v15, 3  ;;  %v203_v60 = vsub.s32 4, %v1776_v6  ;;  %vm566_vm10 = vc.u32 %v1850_v19, %v1854_v22 }
 0x12b   :  { %v725_v58 = vor.u32 8388608, %v724_v46  ;;  %v757_v55 = vsel %vm749_vm8, %v736_v48, %v739_v49  ;;  %v759_v61 = vsel %vm751_vm9, %v742_v50, %v758_v53  ;;  %v548_v63 = vsel %vm542_vm5, %v545_v51, %v547_v26 }
 0x12c   :  { %v761_v1 = vsel %vm749_vm8, %v739_v49, %v742_v50  ;;  %v763_v3 = vsel %vm751_vm9, %v745_v35, %v762_v54  ;;  %vm750_vm11 = vcmp.lt.s32.totalorder %v1845_v15, 2  ;;  %v1899_v5 = vsub.s32 32, %v627_v56 }
 0x12d   :  { %vm832_vm12 = vcmp.gt.s32.totalorder %v831_v57, 0  ;;  %v568_v7 = vsel %vm566_vm10, %v567_v59, %v1855_v23  ;;  %v733_v10 = vshrl.u32 %v2629_v52, %v732_v9  ;;  %v760_v37 = vsel %vm750_vm11, %v757_v55, %v759_v61 }
 0x12e   :  { %v564_v12 = vmul.u32 %v1842_v0, %v548_v63  ;;  %v754_v13 = vsel %vm752_vm7, %v742_v50, 2102212464  ;;  %v764_v14 = vsel %vm750_vm11, %v761_v1, %v763_v3  ;;  %v1910_v16 = vshll.u32 %v725_v58, 8  ;;  %v433_v27 = vpop.f32.mrf.mxu0 }
 0x12f   :  { %v753_v18 = vsel %vm749_vm8, %v733_v10, %v736_v48  ;;  %v620_v20 = vand.u32 8388607, %v2625_v4  ;;  %v833_v9 = vsel %vm832_vm12, %v831_v57, 0  ;;  %v204_v21 = vrot.slane %v1779_v8, %v203_v60 }
 0x130   :  { %v1917_v23 = vadd.s32 %v568_v7, %v564_v12  ;;  %v1920_v0 = vmul.u32.u64.low %v1910_v16, %v760_v37  ;;  %v1921_v24 = vmul.u32.u64.high %v1910_v16, %v760_v37, %v1920_v0  ;;  %v640_v25 = vshrl.u32 %v1728_v32, %v1899_v5 }
 0x131   :  { %v755_v30 = vsel %vm751_vm9, %v739_v49, %v754_v13  ;;  %v1929_v31 = vmul.u32.u64.low %v1910_v16, %v764_v14  ;;  %v1930_v33 = vmul.u32.u64.high %v1910_v16, %v764_v14, %v1929_v31  ;;  %v643_v35 = vshrl.u32 %v2641_v29, %v1899_v5 }
 0x132   :  { %v1934_v36 = vshrl.u32 %v625_v47, 5  ;;  %v631_v39 = vshrl.u32 %v2631_v43, %v1899_v5  ;;  %v639_v41 = vshll.u32 %v2637_v40, %v627_v56  ;;  %v835_v42 = vand.u32 31, %v833_v9 }
 0x133   :  { %v634_v44 = vshrl.u32 %v2635_v38, %v1899_v5  ;;  %v637_v45 = vshrl.u32 %v2637_v40, %v1899_v5  ;;  %v642_v46 = vshll.u32 %v1728_v32, %v627_v56  ;;  %v1944_v48 = vadd.f32 %v433_v27, %v204_v21 }
 0x134   :  { %v621_v49 = vor.u32 8388608, %v620_v20  ;;  %v630_v47 = vshll.u32 %v2629_v52, %v627_v56  ;;  %v641_v50 = vor.u32 %v640_v25, %v639_v41  ;;  %v211_v51 = vsub.s32 6, %v1776_v6 }
 0x135   :  { %v570_v53 = vadd.s32 536870912, %v1917_v23  ;;  %v633_v26 = vshll.u32 %v2631_v43, %v627_v56  ;;  %v636_v54 = vshll.u32 %v2635_v38, %v627_v56  ;;  %v644_v57 = vor.u32 %v643_v35, %v642_v46 }
 0x136   :  { %v1953_v59 = vsel %vm750_vm11, %v753_v18, %v755_v30  ;;  %v1955_v60 = vor.u32 %v631_v39, %v630_v47  ;;  %v1957_v58 = vsub.s32 32, %v835_v42  ;;  %vm648_vm13 = vcmp.lt.s32.totalorder %v1934_v36, 4 }
 0x137   :  { %v1959_v55 = vor.u32 %v634_v44, %v633_v26  ;;  %v638_v61 = vor.u32 %v637_v45, %v636_v54  ;;  %v928_v63 = vand.u32 2139095040, %v1944_v48  ;;  %v654_v1 = vsel %vm648_vm13, %v641_v50, 920167782 }
 0x138   :  { %v1965_v56 = vshll.u32 %v621_v49, 8  ;;  %v2624_v15 = vand.u32 2147483647, %v1824_v62  ;;  %v1969_v3 = vrot.slane %v1779_v8, %v211_v51  ;;  %v1971_v7 = vshrl.u32 %v570_v53, 30 }
 0x139   :  { %v772_v10 = vmul.u32 %v1910_v16, %v1953_v59  ;;  %v775_v37 = vadd.s32 1, %v1921_v24  ;;  %v658_v12 = vsel %vm648_vm13, %v644_v57, 1326507024  ;;  %vm774_vm14 = vc.u32 %v1930_v33, %v1920_v0 }
 0x13a   :  { %vm645_vm15 = vcmp.lt.s32.totalorder %v1934_v36, 1  ;;  %vm647_vm0 = vcmp.lt.s32.totalorder %v1934_v36, 3  ;;  %v848_v13 = vshrl.u32 %v1728_v32, %v1957_v58  ;;  %v851_v18 = vshrl.u32 %v2641_v29, %v1957_v58 }
 0x13b   :  { %v653_v14 = vsel %vm645_vm15, %v1955_v60, %v1959_v55  ;;  %v655_v16 = vsel %vm647_vm0, %v638_v61, %v654_v1  ;;  %v929_v20 = vshrl.u32 %v928_v63, 23  ;;  %v657_v21 = vsel %vm645_vm15, %v1959_v55, %v638_v61 }
 0x13c   :  { %v659_v25 = vsel %vm647_vm0, %v641_v50, %v658_v12  ;;  %v839_v27 = vshrl.u32 %v2631_v43, %v1957_v58  ;;  %v847_v30 = vshll.u32 %v2637_v40, %v835_v42  ;;  %v2000_v31 = vshrl.u32 %v833_v9, 5 }
 0x13d   :  { %v842_v35 = vshrl.u32 %v2635_v38, %v1957_v58  ;;  %v845_v39 = vshrl.u32 %v2637_v40, %v1957_v58  ;;  %v850_v41 = vshll.u32 %v1728_v32, %v835_v42  ;;  %vm646_vm1 = vcmp.lt.s32.totalorder %v1934_v36, 2 }
 0x13e   :  { %v838_v44 = vshll.u32 %v2629_v52, %v835_v42  ;;  %v849_v45 = vor.u32 %v848_v13, %v847_v30  ;;  %v1535_v46 = vadd.s32 4294967169, %v929_v20  ;;  %v656_v49 = vsel %vm646_vm1, %v653_v14, %v655_v16 }
 0x13f   :  { %v841_v9 = vshll.u32 %v2631_v43, %v835_v42  ;;  %v844_v47 = vshll.u32 %v2635_v38, %v835_v42  ;;  %v852_v50 = vor.u32 %v851_v18, %v850_v41  ;;  %v776_v51 = vsel %vm774_vm14, %v775_v37, %v1921_v24 }
 0x140   :  { %v660_v53 = vsel %vm646_vm1, %v657_v21, %v659_v25  ;;  %v828_v26 = vand.u32 8388607, %v2624_v15  ;;  %v2021_v54 = vor.u32 %v839_v27, %v838_v44  ;;  %vm856_vm2 = vcmp.lt.s32.totalorder %v2000_v31, 4 }
 0x141   :  { %v2023_v57 = vor.u32 %v842_v35, %v841_v9  ;;  %v846_v59 = vor.u32 %v845_v39, %v844_v47  ;;  %v935_v42 = vadd.s32 1, %v1535_v46  ;;  %v629_v63 = vshrl.u32 %v2629_v52, %v1899_v5  ;;  %v504_v39 = vpop.f32.mrf.mxu1 }
 0x142   :  { %v2029_v1 = vmul.u32.u64.low %v1965_v56, %v656_v49  ;;  %v2030_v24 = vmul.u32.u64.high %v1965_v56, %v656_v49, %v2029_v1  ;;  %v862_v37 = vsel %vm856_vm2, %v849_v45, 920167782  ;;  %v866_v14 = vsel %vm856_vm2, %v852_v50, 1326507024 }
 0x143   :  { %v2036_v12 = vmul.u32.u64.low %v1965_v56, %v660_v53  ;;  %v2037_v13 = vmul.u32.u64.high %v1965_v56, %v660_v53, %v2036_v12  ;;  %vm936_vm3 = vcmp.gt.s32.totalorder %v935_v42, 0  ;;  %v650_v16 = vsel %vm648_vm13, %v638_v61, 2102212464 }
 0x144   :  { %vm853_vm4 = vcmp.lt.s32.totalorder %v2000_v31, 1  ;;  %vm855_vm5 = vcmp.lt.s32.totalorder %v2000_v31, 3  ;;  %v937_v5 = vsel %vm936_vm3, %v935_v42, 0  ;;  %v829_v18 = vor.u32 8388608, %v828_v26 }
 0x145   :  { %v861_v20 = vsel %vm853_vm4, %v2021_v54, %v2023_v57  ;;  %v863_v21 = vsel %vm855_vm5, %v846_v59, %v862_v37  ;;  %v939_v25 = vand.u32 31, %v937_v5  ;;  %v572_v27 = vshll.u32 %v1971_v7, 30 }
 0x146   :  { %v2052_v30 = vadd.s32 %v776_v51, %v772_v10  ;;  %v865_v61 = vsel %vm853_vm4, %v2023_v57, %v846_v59  ;;  %v867_v35 = vsel %vm855_vm5, %v849_v45, %v866_v14  ;;  %v649_v41 = vsel %vm645_vm15, %v629_v63, %v1955_v60 }
 0x147   :  { %v651_v44 = vsel %vm647_vm0, %v1959_v55, %v650_v16  ;;  %vm854_vm6 = vcmp.lt.s32.totalorder %v2000_v31, 2  ;;  %v2068_v46 = vsub.s32 32, %v939_v25  ;;  %v2072_v45 = vshll.u32 %v829_v18, 8 }
 0x148   :  { %v864_v10 = vsel %vm854_vm6, %v861_v20, %v863_v21  ;;  %v868_v49 = vsel %vm854_vm6, %v865_v61, %v867_v35  ;;  %v2075_v9 = vadd.f32 %v504_v39, %v1969_v3  ;;  %v2078_v60 = vsub.s32 %v1917_v23, %v572_v27 }
 0x149   :  { %v778_v55 = vadd.s32 536870912, %v2052_v30  ;;  %v652_v47 = vsel %vm646_vm1, %v649_v41, %v651_v44  ;;  %v671_v50 = vadd.s32 1, %v2030_v24  ;;  %vm670_vm7 = vc.u32 %v2037_v13, %v2029_v1 }
 0x14a   :  { %v2087_v51 = vmul.u32.u64.low %v2072_v45, %v864_v10  ;;  %v2088_v53 = vmul.u32.u64.high %v2072_v45, %v864_v10, %v2087_v51  ;;  %v2623_v3 = vand.u32 2147483647, %v1944_v48  ;;  %v2096_v42 = vshrl.u32 %v937_v5, 5 }
 0x14b   :  { %v2093_v23 = vmul.u32.u64.low %v2072_v45, %v868_v49  ;;  %v2094_v26 = vmul.u32.u64.high %v2072_v45, %v868_v49, %v2093_v23  ;;  %v943_v36 = vshrl.u32 %v2631_v43, %v2068_v46  ;;  %v946_v63 = vshrl.u32 %v2635_v38, %v2068_v46 }
 0x14c   :  { %v949_v37 = vshrl.u32 %v2637_v40, %v2068_v46  ;;  %v951_v12 = vshll.u32 %v2637_v40, %v939_v25  ;;  %v952_v14 = vshrl.u32 %v1728_v32, %v2068_v46  ;;  %v672_v16 = vsel %vm670_vm7, %v671_v50, %v2030_v24 }
 0x14d   :  { %v942_v18 = vshll.u32 %v2629_v52, %v939_v25  ;;  %v945_v5 = vshll.u32 %v2631_v43, %v939_v25  ;;  %v1136_v20 = vand.u32 2139095040, %v2075_v9  ;;  %v948_v21 = vshll.u32 %v2635_v38, %v939_v25 }
 0x14e   :  { %v953_v27 = vor.u32 %v952_v14, %v951_v12  ;;  %v954_v61 = vshll.u32 %v1728_v32, %v939_v25  ;;  %v955_v35 = vshrl.u32 %v2641_v29, %v2068_v46  ;;  %v668_v39 = vmul.u32 %v1965_v56, %v652_v47 }
 0x14f   :  { %v858_v41 = vsel %vm856_vm2, %v846_v59, 2102212464  ;;  %v932_v24 = vand.u32 8388607, %v2623_v3  ;;  %v944_v44 = vor.u32 %v943_v36, %v942_v18  ;;  %v947_v10 = vor.u32 %v946_v63, %v945_v5 }
 0x150   :  { %v950_v49 = vor.u32 %v949_v37, %v948_v21  ;;  %v956_v50 = vor.u32 %v955_v35, %v954_v61  ;;  %vm960_vm8 = vcmp.lt.s32.totalorder %v2096_v42, 4  ;;  %v673_v23 = vadd.s32 %v672_v16, %v668_v39 }
 0x151   :  { %v837_v25 = vshrl.u32 %v2629_v52, %v1957_v58  ;;  %v966_v12 = vsel %vm960_vm8, %v953_v27, 920167782  ;;  %v575_v56 = vsub.s32 0, %v2078_v60  ;;  %v2126_v47 = vshrl.u32 %v778_v55, 30 }
 0x152   :  { %v970_v59 = vsel %vm960_vm8, %v956_v50, 1326507024  ;;  %v1137_v36 = vshrl.u32 %v1136_v20, 23  ;;  %v859_v37 = vsel %vm855_vm5, %v2023_v57, %v858_v41  ;;  %vm957_vm9 = vcmp.lt.s32.totalorder %v2096_v42, 1 }
 0x153   :  { %v857_v63 = vsel %vm853_vm4, %v837_v25, %v2021_v54  ;;  %vm959_vm10 = vcmp.lt.s32.totalorder %v2096_v42, 3  ;;  %v879_v58 = vadd.s32 1, %v2088_v53  ;;  %v933_v55 = vor.u32 8388608, %v932_v24 }
 0x154   :  { %v965_v14 = vsel %vm957_vm9, %v944_v44, %v947_v10  ;;  %v967_v16 = vsel %vm959_vm10, %v950_v49, %v966_v12  ;;  %v674_v18 = vadd.s32 536870912, %v673_v23  ;;  %vm878_vm11 = vc.u32 %v2094_v26, %v2087_v51 }
 0x155   :  { %v969_v54 = vsel %vm957_vm9, %v947_v10, %v950_v49  ;;  %v971_v57 = vsel %vm959_vm10, %v953_v27, %v970_v59  ;;  %v860_v5 = vsel %vm854_vm6, %v857_v63, %v859_v37  ;;  %vm958_vm12 = vcmp.lt.s32.totalorder %v2096_v42, 2 }
 0x156   :  { %v1543_v20 = vadd.s32 4294967169, %v1137_v36  ;;  %v1520_v21 = vmin.u32 %v575_v56, %v2078_v60  ;;  %v968_v61 = vsel %vm958_vm12, %v965_v14, %v967_v16  ;;  %v880_v35 = vsel %vm878_vm11, %v879_v58, %v2088_v53 }
 0x157   :  { %v972_v39 = vsel %vm958_vm12, %v969_v54, %v971_v57  ;;  %v973_v41 = vshll.u32 %v933_v55, 8  ;;  %v780_v27 = vshll.u32 %v2126_v47, 30  ;;  %v2159_v50 = vshrl.u32 %v674_v18, 30 }
 0x158   :  { %v1143_v24 = vadd.s32 1, %v1543_v20  ;;  %v876_v31 = vmul.u32 %v2072_v45, %v860_v5  ;;  %v962_v25 = vsel %vm960_vm8, %v950_v49, 2102212464  ;;  %v941_v59 = vshrl.u32 %v2629_v52, %v2068_v46 }
 0x159   :  { %v2164_v12 = vmul.u32.u64.low %v973_v41, %v968_v61  ;;  %v2165_v56 = vmul.u32.u64.high %v973_v41, %v968_v61, %v2164_v12  ;;  %v2172_v36 = vmul.u32.u64.low %v973_v41, %v972_v39  ;;  %v2173_v63 = vmul.u32.u64.high %v973_v41, %v972_v39, %v2172_v36 }
 0x15a   :  { %vm1144_vm13 = vcmp.gt.s32.totalorder %v1143_v24, 0  ;;  %v2168_v53 = vadd.s32 %v880_v35, %v876_v31  ;;  %v577_v37 = vclz %v1520_v21  ;;  %v207_v45 = vsub.s32 5, %v1776_v6 }
 0x15b   :  { %v1145_v58 = vsel %vm1144_vm13, %v1143_v24, 0  ;;  %v2177_v55 = vsub.s32 %v2052_v30, %v780_v27  ;;  %v961_v49 = vsel %vm957_vm9, %v941_v59, %v944_v44  ;;  %v963_v14 = vsel %vm959_vm10, %v947_v10, %v962_v25  ;;  %v435_v44 = vpop.f32.mrf.mxu0 }
 0x15c   :  { %v1147_v16 = vand.u32 31, %v1145_v58  ;;  %v2622_v18 = vand.u32 2147483647, %v2075_v9  ;;  %v676_v46 = vshll.u32 %v2159_v50, 30  ;;  %v882_v54 = vadd.s32 536870912, %v2168_v53 }
 0x15d   :  { %v964_v5 = vsel %vm958_vm12, %v961_v49, %v963_v14  ;;  %v208_v30 = vrot.slane %v1779_v8, %v207_v45  ;;  %v1521_v20 = vadd.s32 4294967294, %v577_v37  ;;  %v783_v21 = vsub.s32 0, %v2177_v55 }
 0x15e   :  { %v1148_v57 = vsub.s32 32, %v1147_v16  ;;  %v983_v61 = vadd.s32 1, %v2165_v56  ;;  %v1140_v10 = vand.u32 8388607, %v2622_v18  ;;  %v2195_v24 = vsub.s32 %v673_v23, %v676_v46 }
 0x15f   :  { %v2197_v27 = vshrl.u32 %v882_v54, 30  ;;  %v980_v42 = vmul.u32 %v973_v41, %v964_v5  ;;  %vm982_vm14 = vc.u32 %v2173_v63, %v2164_v12  ;;  %v1150_v31 = vshll.u32 %v2629_v52, %v1147_v16 }
 0x160   :  { %v1151_v35 = vshrl.u32 %v2631_v43, %v1148_v57  ;;  %v1154_v39 = vshrl.u32 %v2635_v38, %v1148_v57  ;;  %v1153_v25 = vshll.u32 %v2631_v43, %v1147_v16  ;;  %v1157_v59 = vshrl.u32 %v2637_v40, %v1148_v57 }
 0x161   :  { %v2204_v36 = vadd.f32 %v435_v44, %v208_v30  ;;  %v1146_v37 = vshrl.u32 %v1145_v58, 5  ;;  %v1156_v45 = vshll.u32 %v2635_v38, %v1147_v16  ;;  %v1159_v23 = vshll.u32 %v2637_v40, %v1147_v16 }
 0x162   :  { %v1160_v49 = vshrl.u32 %v1728_v32, %v1148_v57  ;;  %v984_v41 = vsel %vm982_vm14, %v983_v61, %v2165_v56  ;;  %v1141_v14 = vor.u32 8388608, %v1140_v10  ;;  %v1152_v46 = vor.u32 %v1151_v35, %v1150_v31 }
 0x163   :  { %v1155_v54 = vor.u32 %v1154_v39, %v1153_v25  ;;  %v1158_v5 = vor.u32 %v1157_v59, %v1156_v45  ;;  %v1162_v3 = vshll.u32 %v1728_v32, %v1147_v16  ;;  %v1163_v15 = vshrl.u32 %v2641_v29, %v1148_v57 }
 0x164   :  { %v1161_v18 = vor.u32 %v1160_v49, %v1159_v23  ;;  %vm1522_vm15 = vcmp.lt.s32.totalorder %v1521_v20, 0  ;;  %v1528_v58 = vmin.u32 %v783_v21, %v2177_v55  ;;  %v679_v30 = vsub.s32 0, %v2195_v24 }
 0x165   :  { %v884_v44 = vshll.u32 %v2197_v27, 30  ;;  %v985_v4 = vadd.s32 %v984_v41, %v980_v42  ;;  %v1164_v2 = vor.u32 %v1163_v15, %v1162_v3  ;;  %vm1165_vm0 = vcmp.lt.s32.totalorder %v1146_v37, 1 }
 0x166   :  { %v1032_v56 = vand.u32 2139095040, %v2204_v36  ;;  %vm1167_vm1 = vcmp.lt.s32.totalorder %v1146_v37, 3  ;;  %vm1168_vm2 = vcmp.lt.s32.totalorder %v1146_v37, 4  ;;  %v1173_v61 = vsel %vm1165_vm0, %v1152_v46, %v1155_v54 }
 0x167   :  { %v1181_v10 = vshll.u32 %v1141_v14, 8  ;;  %v1170_v16 = vsel %vm1168_vm2, %v1158_v5, 2102212464  ;;  %v1174_v35 = vsel %vm1168_vm2, %v1161_v18, 920167782  ;;  %v1177_v39 = vsel %vm1165_vm0, %v1155_v54, %v1158_v5 }
 0x168   :  { %v1178_v31 = vsel %vm1168_vm2, %v1164_v2, 1326507024  ;;  %v1149_v21 = vshrl.u32 %v2629_v52, %v1148_v57  ;;  %vm1166_vm3 = vcmp.lt.s32.totalorder %v1146_v37, 2  ;;  %v1175_v25 = vsel %vm1167_vm1, %v1158_v5, %v1174_v35 }
 0x169   :  { %v1179_v15 = vsel %vm1167_vm1, %v1161_v18, %v1178_v31  ;;  %v986_v3 = vadd.s32 536870912, %v985_v4  ;;  %v1176_v42 = vsel %vm1166_vm3, %v1173_v61, %v1175_v25  ;;  %v1033_v45 = vshrl.u32 %v1032_v56, 23 }
 0x16a   :  { %v1180_v59 = vsel %vm1166_vm3, %v1177_v39, %v1179_v15  ;;  %v1169_v23 = vsel %vm1165_vm0, %v1149_v21, %v1152_v46  ;;  %v1171_v49 = vsel %vm1167_vm1, %v1155_v54, %v1170_v16  ;;  %v785_v2 = vclz %v1528_v58 }
 0x16b   :  { %v2225_v41 = vmul.u32.u64.low %v1181_v10, %v1180_v59  ;;  %v2226_v14 = vmul.u32.u64.high %v1181_v10, %v1180_v59, %v2225_v41  ;;  %v2228_v57 = vmul.u32.u64.low %v1181_v10, %v1176_v42  ;;  %v2229_v34 = vmul.u32.u64.high %v1181_v10, %v1176_v42, %v2228_v57 }
 0x16c   :  { %v1539_v5 = vadd.s32 4294967169, %v1033_v45  ;;  %v580_v18 = vsel %vm1522_vm15, 0, %v1521_v20  ;;  %v1524_v61 = vmin.u32 %v679_v30, %v2195_v24  ;;  %v1172_v35 = vsel %vm1166_vm3, %v1169_v23, %v1171_v49 }
 0x16d   :  { %v2236_v46 = vsub.s32 %v2168_v53, %v884_v44  ;;  %v2238_v54 = vshrl.u32 %v986_v3, 30  ;;  %vm1190_vm4 = vc.u32 %v2226_v14, %v2228_v57  ;;  %v1529_v58 = vadd.s32 4294967294, %v785_v2 }
 0x16e   :  { %v1039_v56 = vadd.s32 1, %v1539_v5  ;;  %v1191_v16 = vadd.s32 1, %v2229_v34  ;;  %v581_v39 = vsub.s32 32, %v580_v18  ;;  %v585_v31 = vsub.s32 4294967266, %v580_v18 }
 0x16f   :  { %2643 = vst [vmem:[#allocation12_spill] sm:$0xff] %v2238_v54  ;;  %v1188_v20 = vmul.u32 %v1181_v10, %v1172_v35  ;;  %v681_v30 = vclz %v1524_v61  ;;  %v565_v53 = vadd.s32 %v1854_v22, %v1850_v19  ;;  %v887_v44 = vsub.s32 0, %v2236_v46 }
 0x170   :  { %vm1040_vm5 = vcmp.gt.s32.totalorder %v1039_v56, 0  ;;  %v1192_v37 = vsel %vm1190_vm4, %v1191_v16, %v2229_v34  ;;  %v988_v15 = vshll.u32 %v2238_v54, 30  ;;  %vm1530_vm6 = vcmp.lt.s32.totalorder %v1529_v58, 0 }
 0x171   :  { %v1041_v21 = vsel %vm1040_vm5, %v1039_v56, 0  ;;  %v1193_v3 = vadd.s32 %v1192_v37, %v1188_v20  ;;  %v2628_v42 = vand.u32 2147483647, %v2204_v36  ;;  %v583_v59 = vshrl.u32 %v565_v53, %v581_v39 }
 0x172   :  { %v1043_v25 = vand.u32 31, %v1041_v21  ;;  %v586_v45 = vadd.s32 127, %v585_v31  ;;  %v1525_v10 = vadd.s32 4294967294, %v681_v30  ;;  %v582_v41 = vshll.u32 %v2078_v60, %v580_v18 }
 0x173   :  { %v1194_v23 = vadd.s32 536870912, %v1193_v3  ;;  %v2250_v34 = vsel %vm1530_vm6, 0, %v1529_v58  ;;  %v1532_v2 = vmin.u32 %v887_v44, %v2236_v46  ;;  %v2253_v19 = vsub.s32 %v985_v4, %v988_v15 }
 0x174   :  { %v1044_v49 = vsub.s32 32, %v1043_v25  ;;  %v1733_v22 = vmov 1966171168   ;;  %v1036_v61 = vand.u32 8388607, %v2628_v42  ;;  %v2259_v35 = vor.u32 %v583_v59, %v582_v41 }
 0x175   :  { %v2255_v5 = vunpack.c.l.s4 %v1733_v22  ;;  %v587_v56 = vshll.u32 %v586_v45, 23  ;;  %v773_v16 = vadd.s32 %v1920_v0, %v1930_v33  ;;  %v2263_v39 = vshrl.u32 %v1194_v23, 30 }
 0x176   :  { %v793_v60 = vsub.s32 4294967266, %v2250_v34  ;;  %vm1526_vm7 = vcmp.lt.s32.totalorder %v1525_v10, 0  ;;  %v1047_v4 = vshrl.u32 %v2631_v43, %v1044_v49  ;;  %v1050_v18 = vshrl.u32 %v2635_v38, %v1044_v49 }
 0x177   :  { %2644 = vst [vmem:[#allocation13_spill] sm:$0xff] %v2263_v39  ;;  %v889_v58 = vclz %v1532_v2  ;;  %v991_v31 = vsub.s32 0, %v2253_v19  ;;  %v1053_v20 = vshrl.u32 %v2637_v40, %v1044_v49  ;;  %v215_v30 = vsub.s32 7, %v1776_v6 }
 0x178   :  { %v1037_v37 = vor.u32 8388608, %v1036_v61  ;;  %v1042_v53 = vshrl.u32 %v1041_v21, 5  ;;  %v1046_v0 = vshll.u32 %v2629_v52, %v1043_v25  ;;  %v1049_v33 = vshll.u32 %v2631_v43, %v1043_v25 }
 0x179   :  { %v1196_v44 = vshll.u32 %v2263_v39, 30  ;;  %v1052_v15 = vshll.u32 %v2635_v38, %v1043_v25  ;;  %v1055_v59 = vshll.u32 %v2637_v40, %v1043_v25  ;;  %v1056_v45 = vshrl.u32 %v1728_v32, %v1044_v49 }
 0x17a   :  { %v1048_v23 = vor.u32 %v1047_v4, %v1046_v0  ;;  %v1051_v41 = vor.u32 %v1050_v18, %v1049_v33  ;;  %v1058_v2 = vshll.u32 %v1728_v32, %v1043_v25  ;;  %v1059_v22 = vshrl.u32 %v2641_v29, %v1044_v49  ;;  %v506_v25 = vpop.f32.mrf.mxu1 }
 0x17b   :  { %v588_v61 = vor.u32 4788187, %v587_v56  ;;  %v789_v21 = vsub.s32 32, %v2250_v34  ;;  %v1054_v42 = vor.u32 %v1053_v20, %v1052_v15  ;;  %v1057_v52 = vor.u32 %v1056_v45, %v1055_v59 }
 0x17c   :  { %v794_v43 = vadd.s32 127, %v793_v60  ;;  %v2281_v39 = vsel %vm1526_vm7, 0, %v1525_v10  ;;  %v1060_v38 = vor.u32 %v1059_v22, %v1058_v2  ;;  %v216_v40 = vrot.slane %v1779_v8, %v215_v30 }
 0x17d   :  { %v1533_v54 = vadd.s32 4294967294, %v889_v58  ;;  %v1536_v4 = vmin.u32 %v991_v31, %v2253_v19  ;;  %v2285_v18 = vsub.s32 %v1193_v3, %v1196_v44  ;;  %vm1061_vm8 = vcmp.lt.s32.totalorder %v1042_v53, 1 }
 0x17e   :  { %v2645_v0 = vmov 683565275   ;;  %vm1064_vm9 = vcmp.lt.s32.totalorder %v1042_v53, 4  ;;  %v1069_v33 = vsel %vm1061_vm8, %v1048_v23, %v1051_v41  ;;  %v1077_v20 = vshll.u32 %v1037_v37, 8 }
 0x17f   :  { %v1045_v56 = vshrl.u32 %v2645_v0, %v1044_v49  ;;  %vm1063_vm10 = vcmp.lt.s32.totalorder %v1042_v53, 3  ;;  %v1066_v60 = vsel %vm1064_vm9, %v1054_v42, 2102212464  ;;  %v1070_v15 = vsel %vm1064_vm9, %v1057_v52, 920167782 }
 0x180   :  { %v1073_v10 = vsel %vm1061_vm8, %v1051_v41, %v1054_v42  ;;  %vm1062_vm11 = vcmp.lt.s32.totalorder %v1042_v53, 2  ;;  %v1071_v59 = vsel %vm1063_vm10, %v1054_v42, %v1070_v15  ;;  %v1074_v45 = vsel %vm1064_vm9, %v1060_v38, 1326507024 }
 0x181   :  { %v2288_v8 = vadd.f32 %v506_v25, %v216_v40  ;;  %v1199_v58 = vsub.s32 0, %v2285_v18  ;;  %v1065_v3 = vsel %vm1061_vm8, %v1045_v56, %v1048_v23  ;;  %v1072_v31 = vsel %vm1062_vm11, %v1069_v33, %v1071_v59 }
 0x182   :  { %v1075_v30 = vsel %vm1063_vm10, %v1057_v52, %v1074_v45  ;;  %v1067_v44 = vsel %vm1063_vm10, %v1051_v41, %v1066_v60  ;;  %v2293_v2 = vmul.u32.u64.low %v1077_v20, %v1072_v31  ;;  %v2294_v37 = vmul.u32.u64.high %v1077_v20, %v1072_v31, %v2293_v2 }
 0x183   :  { %v1076_v49 = vsel %vm1062_vm11, %v1073_v10, %v1075_v30  ;;  %v589_v22 = vand.u32 2147483647, %v588_v61  ;;  %v591_v29 = vcvt.s32.f32 %v2259_v35  ;;  %v791_v42 = vshrl.u32 %v773_v16, %v789_v21 }
 0x184   :  { %v795_v38 = vshll.u32 %v794_v43, 23  ;;  %v993_v40 = vclz %v1536_v4  ;;  %v2298_v25 = vmul.u32.u64.low %v1077_v20, %v1076_v49  ;;  %v2299_v15 = vmul.u32.u64.high %v1077_v20, %v1076_v49, %v2298_v25 }
 0x185   :  { %v1240_v23 = vand.u32 2139095040, %v2288_v8  ;;  %v790_v52 = vshll.u32 %v2177_v55, %v2250_v34  ;;  %v685_v41 = vsub.s32 32, %v2281_v39  ;;  %v689_v56 = vsub.s32 4294967266, %v2281_v39 }
 0x186   :  { %v1068_v33 = vsel %vm1062_vm11, %v1065_v3, %v1067_v44  ;;  %vm1534_vm12 = vcmp.lt.s32.totalorder %v1533_v54, 0  ;;  %v1544_v35 = vmin.u32 %v1199_v58, %v2285_v18  ;;  %v1087_v43 = vadd.s32 1, %v2294_v37 }
 0x187   :  { %v1241_v16 = vshrl.u32 %v1240_v23, 23  ;;  %v592_v61 = vmul.f32 %v591_v29, %v589_v22  ;;  %v792_v21 = vor.u32 %v791_v42, %v790_v52  ;;  %v796_v4 = vor.u32 4788187, %v795_v38 }
 0x188   :  { %v669_v60 = vadd.s32 %v2029_v1, %v2037_v13  ;;  %v1537_v10 = vadd.s32 4294967294, %v993_v40  ;;  %v1084_v55 = vmul.u32 %v1077_v20, %v1068_v33  ;;  %vm1086_vm13 = vc.u32 %v2299_v15, %v2293_v2 }
 0x189   :  { %v1547_v34 = vadd.s32 4294967169, %v1241_v16  ;;  %v690_v59 = vadd.s32 127, %v689_v56  ;;  %v2313_v45 = vsel %vm1534_vm12, 0, %v1533_v54  ;;  %v1088_v58 = vsel %vm1086_vm13, %v1087_v43, %v2294_v37 }
 0x18a   :  { %v687_v53 = vshrl.u32 %v669_v60, %v685_v41  ;;  %v1201_v3 = vclz %v1544_v35  ;;  %v1089_v31 = vadd.s32 %v1088_v58, %v1084_v55  ;;  %v2642_v29 = vand.u32 2147483647, %v2288_v8 }
 0x18b   :  { %v1247_v30 = vadd.s32 1, %v1547_v34  ;;  %vm511_vm14 = vcmp.lt.s32.totalorder %v1782_v11, 0  ;;  %v593_v1 = vxor.u32 2147483648, %v592_v61  ;;  %v799_v13 = vcvt.s32.f32 %v792_v21 }
 0x18c   :  { %v686_v20 = vshll.u32 %v2195_v24, %v2281_v39  ;;  %v797_v44 = vand.u32 2147483647, %v796_v4  ;;  %vm1538_vm15 = vcmp.lt.s32.totalorder %v1537_v10, 0  ;;  %v1090_v49 = vadd.s32 536870912, %v1089_v31 }
 0x18d   :  { %vm1248_vm0 = vcmp.gt.s32.totalorder %v1247_v30, 0  ;;  %v691_v22 = vshll.u32 %v690_v59, 23  ;;  %v897_v37 = vsub.s32 4294967266, %v2313_v45  ;;  %v1545_v38 = vadd.s32 4294967294, %v1201_v3 }
 0x18e   :  { %v2320_v54 = vor.u32 %v687_v53, %v686_v20  ;;  %v1249_v42 = vsel %vm1248_vm0, %v1247_v30, 0  ;;  %v2323_v40 = vshrl.u32 %v1090_v49, 30  ;;  %v1244_v25 = vand.u32 8388607, %v2642_v29 }
 0x18f   :  { %v1251_v23 = vand.u32 31, %v1249_v42  ;;  %v2329_v24 = vsel %vm511_vm14, %v593_v1, %v592_v61  ;;  %v2333_v41 = vsel %vm1538_vm15, 0, %v1537_v10  ;;  %v2335_v56 = vmul.f32 %v799_v13, %v797_v44 }
 0x190   :  { %v877_v33 = vadd.s32 %v2087_v51, %v2094_v26  ;;  %v1092_v35 = vshll.u32 %v2323_v40, 30  ;;  %v2340_v16 = vor.u32 4788187, %v691_v22  ;;  %v893_v61 = vsub.s32 32, %v2313_v45 }
 0x191   :  { %v1252_v43 = vsub.s32 32, %v1251_v23  ;;  %v898_v4 = vadd.s32 127, %v897_v37  ;;  %v1001_v60 = vsub.s32 4294967266, %v2333_v41  ;;  %vm1546_vm1 = vcmp.lt.s32.totalorder %v1545_v38, 0 }
 0x192   :  { %v2345_v10 = vsub.s32 %v1089_v31, %v1092_v35  ;;  %v1245_v55 = vor.u32 8388608, %v1244_v25  ;;  %v1254_v34 = vshll.u32 %v2645_v0, %v1251_v23  ;;  %v2646_v53 = vmov 2475754826  }
 0x193   :  { %v1255_v51 = vshrl.u32 %v2646_v53, %v1252_v43  ;;  %v1257_v26 = vshll.u32 %v2646_v53, %v1251_v23  ;;  %v2647_v59 = vmov 2131351028   ;;  %v1250_v30 = vshrl.u32 %v1249_v42, 5 }
 0x194   :  { %v1258_v58 = vshrl.u32 %v2647_v59, %v1252_v43  ;;  %v1095_v3 = vsub.s32 0, %v2345_v10  ;;  %v1260_v1 = vshll.u32 %v2647_v59, %v1251_v23  ;;  %v2648_v13 = vmov 2102212464  }
 0x195   :  { %v1261_v20 = vshrl.u32 %v2648_v13, %v1252_v43  ;;  %v1256_v44 = vor.u32 %v1255_v51, %v1254_v34  ;;  %v1263_v31 = vshll.u32 %v2648_v13, %v1251_v23  ;;  %v1264_v22 = vshrl.u32 %v1728_v32, %v1252_v43 }
 0x196   :  { %v1259_v49 = vor.u32 %v1258_v58, %v1257_v26  ;;  %v899_v37 = vshll.u32 %v898_v4, 23  ;;  %v1540_v25 = vmin.u32 %v1095_v3, %v2345_v10  ;;  %v2649_v53 = vmov 1326507024  }
 0x197   :  { %v1262_v35 = vor.u32 %v1261_v20, %v1260_v1  ;;  %v1267_v29 = vshrl.u32 %v2649_v53, %v1252_v43  ;;  %v1002_v52 = vadd.s32 127, %v1001_v60  ;;  %v2359_v39 = vsel %vm1546_vm1, 0, %v1545_v38 }
 0x198   :  { %v1265_v42 = vor.u32 %v1264_v22, %v1263_v31  ;;  %v1266_v59 = vshll.u32 %v1728_v32, %v1251_v23  ;;  %v1097_v21 = vclz %v1540_v25  ;;  %v1253_v34 = vshrl.u32 %v2645_v0, %v1252_v43 }
 0x199   :  { %vm1269_vm2 = vcmp.lt.s32.totalorder %v1250_v30, 1  ;;  %v1285_v51 = vshll.u32 %v1245_v55, 8  ;;  %vm1271_vm3 = vcmp.lt.s32.totalorder %v1250_v30, 3  ;;  %vm1272_vm4 = vcmp.lt.s32.totalorder %v1250_v30, 4 }
 0x19a   :  { %v1268_v26 = vor.u32 %v1267_v29, %v1266_v59  ;;  %v1277_v4 = vsel %vm1269_vm2, %v1256_v44, %v1259_v49  ;;  %v1541_v58 = vadd.s32 4294967294, %v1097_v21  ;;  %v1274_v3 = vsel %vm1272_vm4, %v1262_v35, 2102212464 }
 0x19b   :  { %v1278_v1 = vsel %vm1272_vm4, %v1265_v42, 920167782  ;;  %v1281_v13 = vsel %vm1269_vm2, %v1259_v49, %v1262_v35  ;;  %vm1270_vm5 = vcmp.lt.s32.totalorder %v1250_v30, 2  ;;  %v1273_v60 = vsel %vm1269_vm2, %v1253_v34, %v1256_v44 }
 0x19c   :  { %v1279_v38 = vsel %vm1271_vm3, %v1262_v35, %v1278_v1  ;;  %v1282_v20 = vsel %vm1272_vm4, %v1268_v26, 1326507024  ;;  %vm1542_vm6 = vcmp.lt.s32.totalorder %v1541_v58, 0  ;;  %v1275_v31 = vsel %vm1271_vm3, %v1259_v49, %v1274_v3 }
 0x19d   :  { %v1280_v32 = vsel %vm1270_vm5, %v1277_v4, %v1279_v38  ;;  %v1283_v23 = vsel %vm1271_vm3, %v1265_v42, %v1282_v20  ;;  %v1100_v0 = vsel %vm1542_vm6, 0, %v1541_v58  ;;  %v2650_v21 = vand.u32 2147483647, %v1782_v11 }
 0x19e   :  { %v1284_v43 = vsel %vm1270_vm5, %v1281_v13, %v1283_v23  ;;  %v2365_v29 = vmul.u32.u64.low %v1285_v51, %v1280_v32  ;;  %v2366_v55 = vmul.u32.u64.high %v1285_v51, %v1280_v32, %v2365_v29  ;;  %v693_v44 = vand.u32 2147483647, %v2340_v16 }
 0x19f   :  { %vm2371_vm7 = vcmp.le.f32.partialorder %v2650_v21, 0.7853982  ;;  %v997_v49 = vsub.s32 32, %v2333_v41  ;;  %v1209_v25 = vsub.s32 4294967266, %v2359_v39  ;;  %v1105_v35 = vsub.s32 4294967266, %v1100_v0 }
 0x1a0   :  { %v895_v53 = vshrl.u32 %v877_v33, %v893_v61  ;;  %v1101_v42 = vsub.s32 32, %v1100_v0  ;;  %v2378_v59 = vmul.u32.u64.low %v1285_v51, %v1284_v43  ;;  %v2379_v34 = vmul.u32.u64.high %v1285_v51, %v1284_v43, %v2378_v59 }
 0x1a1   :  { %v981_v26 = vadd.s32 %v2164_v12, %v2173_v63  ;;  %v1003_v4 = vshll.u32 %v1002_v52, 23  ;;  %v1106_v58 = vadd.s32 127, %v1105_v35  ;;  %v1276_v3 = vsel %vm1270_vm5, %v1273_v60, %v1275_v31 }
 0x1a2   :  { %v894_v16 = vshll.u32 %v2236_v46, %v2313_v45  ;;  %v900_v1 = vor.u32 4788187, %v899_v37  ;;  %v1085_v13 = vadd.s32 %v2293_v2, %v2299_v15  ;;  %v1295_v33 = vadd.s32 1, %v2366_v55 }
 0x1a3   :  { %v2653_v61 = vcvt.s32.f32 %v2320_v54  ;;  %v999_v20 = vshrl.u32 %v981_v26, %v997_v49  ;;  %v1210_v32 = vadd.s32 127, %v1209_v25  ;;  %v1107_v23 = vshll.u32 %v1106_v58, 23 }
 0x1a4   :  { %vm719_vm8 = vcmp.lt.s32.totalorder %v1787_v17, 0  ;;  %v896_v12 = vor.u32 %v895_v53, %v894_v16  ;;  %v1103_v63 = vshrl.u32 %v1085_v13, %v1101_v42  ;;  %v1292_v52 = vmul.u32 %v1285_v51, %v1276_v3 }
 0x1a5   :  { %v696_v38 = vmul.f32 %v2653_v61, %v693_v44  ;;  %vm1294_vm9 = vc.u32 %v2379_v34, %v2365_v29  ;;  %v998_v46 = vshll.u32 %v2253_v19, %v2333_v41  ;;  %v1004_v2 = vor.u32 4788187, %v1003_v4 }
 0x1a6   :  { %v1205_v15 = vsub.s32 32, %v2359_v39  ;;  %v1296_v45 = vsel %vm1294_vm9, %v1295_v33, %v2366_v55  ;;  %v901_v54 = vand.u32 2147483647, %v900_v1  ;;  %v1102_v30 = vshll.u32 %v2345_v10, %v1100_v0 }
 0x1a7   :  { %v1108_v37 = vor.u32 4788187, %v1107_v23  ;;  %v1297_v60 = vadd.s32 %v1296_v45, %v1292_v52  ;;  %v2654_v31 = vand.u32 2147483647, %v1787_v17  ;;  %vm615_vm11 = vcmp.lt.s32.totalorder %v1794_v28, 0 }
 0x1a8   :  { %v1000_v43 = vor.u32 %v999_v20, %v998_v46  ;;  %v1189_v19 = vadd.s32 %v2228_v57, %v2226_v14  ;;  %v1211_v41 = vshll.u32 %v1210_v32, 23  ;;  %v597_v10 = vsel %vm2371_vm7, %v1782_v11, %v2329_v24 }
 0x1a9   :  { %vm2401_vm10 = vcmp.le.f32.partialorder %v2654_v31, 0.7853982  ;;  %v903_v0 = vcvt.s32.f32 %v896_v12  ;;  %v1104_v55 = vor.u32 %v1103_v63, %v1102_v30  ;;  %v1298_v21 = vadd.s32 536870912, %v1297_v60 }
 0x1aa   :  { %v2657_v44 = vsub.s32 4, %v1971_v7  ;;  %v801_v25 = vxor.u32 2147483648, %v2335_v56  ;;  %v1005_v35 = vand.u32 2147483647, %v1004_v2  ;;  %v1207_v53 = vshrl.u32 %v1189_v19, %v1205_v15 }
 0x1ab   :  { %v697_v14 = vxor.u32 2147483648, %v696_v38  ;;  %v904_v57 = vmul.f32 %v903_v0, %v901_v54  ;;  %v1109_v42 = vand.u32 2147483647, %v1108_v37  ;;  %v2418_v59 = vshrl.u32 %v1298_v21, 30 }
 0x1ac   :  { %v596_v49 = vsel %vm511_vm14, %v2657_v44, %v1971_v7  ;;  %1601 = vcosq.f32 %v597_v10  ;;  %v1007_v24 = vcvt.s32.f32 %v1000_v43  ;;  %v1206_v26 = vshll.u32 %v2285_v18, %v2359_v39 }
 0x1ad   :  { %v1212_v4 = vor.u32 4788187, %v1211_v41  ;;  %v598_v58 = vsel %vm2371_vm7, 0, %v596_v49  ;;  %v803_v7 = vsub.s32 4, %v2126_v47  ;;  %v1111_v3 = vcvt.s32.f32 %v1104_v55 }
 0x1ae   :  { %v1300_v16 = vshll.u32 %v2418_v59, 30  ;;  %1603 = vsinq.f32 %v597_v10  ;;  %v802_v1 = vsel %vm719_vm8, %v801_v25, %v2335_v56  ;;  %v1008_v13 = vmul.f32 %v1007_v24, %v1005_v35 }
 0x1af   :  { %v1208_v33 = vor.u32 %v1207_v53, %v1206_v26  ;;  %v698_v61 = vsel %vm615_vm11, %v697_v14, %v696_v38  ;;  %v905_v18 = vxor.u32 2147483648, %v904_v57  ;;  %v1112_v39 = vmul.f32 %v1111_v3, %v1109_v42 }
 0x1b0   :  { %v2431_v20 = vsub.s32 %v1297_v60, %v1300_v16  ;;  %v602_v22 = vadd.s32 3, %v598_v58  ;;  %v2658_v32 = vunpack.c.0.s8 %v2255_v5  ;;  %v2659_v12 = vand.u32 2147483647, %v1794_v28 }
 0x1b1   :  { %v1213_v56 = vand.u32 2147483647, %v1212_v4  ;;  %v804_v38 = vsel %vm719_vm8, %v803_v7, %v2126_v47  ;;  %v805_v52 = vsel %vm2401_vm10, %v1787_v17, %v802_v1  ;;  %v699_v46 = vsub.s32 4, %v2159_v50 }
 0x1b2   :  { %v2436_v23 = vsub.s32 %v2658_v32, %v1776_v6  ;;  %vm2440_vm12 = vcmp.le.f32.partialorder %v2659_v12, 0.7853982  ;;  %v1303_v6 = vsub.s32 0, %v2431_v20  ;;  %vm823_vm13 = vcmp.lt.s32.totalorder %v1824_v62, 0 }
 0x1b3   :  { %v701_v5 = vsel %vm2440_vm12, %v1794_v28, %v698_v61  ;;  %v1009_v2 = vxor.u32 2147483648, %v1008_v13  ;;  %v1215_v15 = vcvt.s32.f32 %v1208_v33  ;;  %v2662_v45 = vand.u32 2147483647, %v1824_v62 }
 0x1b4   :  { %v906_v54 = vsel %vm823_vm13, %v905_v18, %v904_v57  ;;  %v1113_v30 = vxor.u32 2147483648, %v1112_v39  ;;  %v1548_v37 = vmin.u32 %v1303_v6, %v2431_v20  ;;  %v2465_v60 = vand.u32 3, %v602_v22 }
 0x1b5   :  { %vm2458_vm14 = vcmp.le.f32.partialorder %v2662_v45, 0.7853982  ;;  %v806_v31 = vsel %vm2401_vm10, 0, %v804_v38  ;;  %1605 = vcosq.f32 %v805_v52  ;;  %v1216_v43 = vmul.f32 %v1215_v15, %v1213_v56 }
 0x1b6   :  { %v700_v19 = vsel %vm615_vm11, %v699_v46, %v2159_v50  ;;  %1607 = vcosq.f32 %v701_v5  ;;  %vm927_vm15 = vcmp.lt.s32.totalorder %v1944_v48, 0  ;;  %v1305_v41 = vclz %v1548_v37  ;;  %v2674_v46 = vld [vmem:[#allocation12_spill] sm:$0xff] }
 0x1b7   :  { %1609 = vsinq.f32 %v701_v5  ;;  %v909_v10 = vsel %vm2458_vm14, %v1824_v62, %v906_v54  ;;  %v1010_v0 = vsel %vm927_vm15, %v1009_v2, %v1008_v13  ;;  %vm1031_vm0 = vcmp.lt.s32.totalorder %v2204_v36, 0 }
 0x1b8   :  { %1611 = vsinq.f32 %v805_v52  ;;  %v907_v51 = vsub.s32 4, %v2197_v27  ;;  %v1114_v50 = vsel %vm1031_vm0, %v1113_v30, %v1112_v39  ;;  %v1549_v55 = vadd.s32 4294967294, %v1305_v41 }
 0x1b9   :  { %v810_v21 = vadd.s32 3, %v806_v31  ;;  %v702_v44 = vsel %vm2440_vm12, 0, %v700_v19  ;;  %v2665_v49 = vand.u32 2147483647, %v1944_v48  ;;  %v1217_v35 = vxor.u32 2147483648, %v1216_v43  ;;  %v1602_v53 = vpop.eup %1601  ;;  %v2675_v19 = vld [vmem:[#allocation13_spill] sm:$0xff] }
 0x1ba   :  { %1613 = vcosq.f32 %v909_v10  ;;  %v2668_v57 = vand.u32 2147483647, %v2204_v36  ;;  %vm1550_vm3 = vcmp.lt.s32.totalorder %v1549_v55, 0  ;;  %vm1135_vm4 = vcmp.lt.s32.totalorder %v2075_v9, 0 }
 0x1bb   :  { %vm2486_vm1 = vcmp.le.f32.partialorder %v2665_v49, 0.7853982  ;;  %1615 = vsinq.f32 %v909_v10  ;;  %v1308_v26 = vsel %vm1550_vm3, 0, %v1549_v55  ;;  %v1604_v4 = vpop.eup %1603  ;;  %v908_v58 = vsel %vm823_vm13, %v907_v51, %v2197_v27 }
 0x1bc   :  { %v1013_v14 = vsel %vm2486_vm1, %v1944_v48, %v1010_v0  ;;  %vm2495_vm2 = vcmp.le.f32.partialorder %v2668_v57, 0.7853982  ;;  %v1293_v7 = vadd.s32 %v2365_v29, %v2379_v34  ;;  %v1309_v3 = vsub.s32 32, %v1308_v26 }
 0x1bd   :  { %v1117_v24 = vsel %vm2495_vm2, %v2204_v36, %v1114_v50  ;;  %v1313_v16 = vsub.s32 4294967266, %v1308_v26  ;;  %v609_v1 = vxor.u32 2147483648, %v1602_v53  ;;  %v706_v13 = vadd.s32 3, %v702_v44 }
 0x1be   :  { %1617 = vcosq.f32 %v1013_v14  ;;  %v1218_v33 = vsel %vm1135_vm4, %v1217_v35, %v1216_v43  ;;  %v1310_v61 = vshll.u32 %v2431_v20, %v1308_v26  ;;  %v1311_v18 = vshrl.u32 %v1293_v7, %v1309_v3 }
 0x1bf   :  { %1619 = vcosq.f32 %v1117_v24  ;;  %v1314_v39 = vadd.s32 127, %v1313_v16  ;;  %v606_v22 = vxor.u32 2147483648, %v1604_v4  ;;  %v910_v27 = vsel %vm2458_vm14, 0, %v908_v58 }
 0x1c0   :  { %v2671_v32 = vand.u32 2147483647, %v2075_v9  ;;  %1621 = vsinq.f32 %v1117_v24  ;;  %v1115_v12 = vsub.s32 4, %v2323_v40  ;;  %v1312_v20 = vor.u32 %v1311_v18, %v1310_v61 }
 0x1c1   :  { %v1315_v63 = vshll.u32 %v1314_v39, 23  ;;  %vm604_vm6 = vcmp.lt.s32.totalorder %v2465_v60, 2  ;;  %v2524_v56 = vand.u32 3, %v810_v21  ;;  %v2526_v38 = vand.u32 3, %v706_v13 }
 0x1c2   :  { %vm2515_vm5 = vcmp.le.f32.partialorder %v2671_v32, 0.7853982  ;;  %1623 = vsinq.f32 %v1013_v14  ;;  %v1606_v52 = vpop.eup %1605  ;;  %vm605_vm7 = vcmp.eq.s32.totalorder %v2465_v60, 0  ;;  %vm608_vm8 = vcmp.eq.s32.totalorder %v2465_v60, 2 }
 0x1c3   :  { %v1221_v34 = vsel %vm2515_vm5, %v2075_v9, %v1218_v33  ;;  %v1011_v6 = vsub.s32 4, %v2674_v46  ;;  %v1316_v5 = vor.u32 4788187, %v1315_v63  ;;  %v1608_v2 = vpop.eup %1607  ;;  %v607_v15 = vsel %vm605_vm7, %v1602_v53, %v606_v22 }
 0x1c4   :  { %v610_v45 = vsel %vm608_vm8, %v609_v1, %v1604_v4  ;;  %v914_v47 = vadd.s32 3, %v910_v27  ;;  %1625 = vcosq.f32 %v1221_v34  ;;  %v1610_v54 = vpop.eup %1609  ;;  %v1116_v30 = vsel %vm1031_vm0, %v1115_v12, %v2323_v40 }
 0x1c5   :  { %1627 = vsinq.f32 %v1221_v34  ;;  %v1317_v37 = vand.u32 2147483647, %v1316_v5  ;;  %v1319_v31 = vcvt.s32.f32 %v1312_v20  ;;  %v1612_v43 = vpop.eup %1611  ;;  %vm813_vm9 = vcmp.eq.s32.totalorder %v2524_v56, 0 }
 0x1c6   :  { %vm816_vm10 = vcmp.eq.s32.totalorder %v2524_v56, 2  ;;  %vm708_vm11 = vcmp.lt.s32.totalorder %v2526_v38, 2  ;;  %v1219_v41 = vsub.s32 4, %v2675_v19  ;;  %vm709_vm12 = vcmp.eq.s32.totalorder %v2526_v38, 0 }
 0x1c7   :  { %vm712_vm13 = vcmp.eq.s32.totalorder %v2526_v38, 2  ;;  %v1012_v10 = vsel %vm927_vm15, %v1011_v6, %v2674_v46  ;;  %v1320_v40 = vmul.f32 %v1319_v31, %v1317_v37  ;;  %v1614_v0 = vpop.eup %1613  ;;  %vm601_vm14 = vweird.f32 %v1782_v11 }
 0x1c8   :  { %v611_v51 = vsel %vm604_vm6, %v607_v15, %v610_v45  ;;  %v710_v50 = vxor.u32 2147483648, %v1610_v54  ;;  %v713_v55 = vxor.u32 2147483648, %v1608_v2  ;;  %v1118_v21 = vsel %vm2495_vm2, 0, %v1116_v30  ;;  %v1616_v44 = vpop.eup %1615 }
 0x1c9   :  { %v814_v49 = vxor.u32 2147483648, %v1612_v43  ;;  %v817_v35 = vxor.u32 2147483648, %v1606_v52  ;;  %v915_v53 = vand.u32 3, %v914_v47  ;;  %v1321_v14 = vxor.u32 2147483648, %v1320_v40 }
 0x1ca   :  { %vm705_vm0 = vweird.f32 %v1794_v28  ;;  %v1014_v57 = vsel %vm2486_vm1, 0, %v1012_v10  ;;  %v1220_v60 = vsel %vm1135_vm4, %v1219_v41, %v2675_v19  ;;  %vm1239_vm15 = vcmp.lt.s32.totalorder %v2288_v8, 0 }
 0x1cb   :  { %v1323_v24 = vsub.s32 4, %v2418_v59  ;;  %v1618_v42 = vpop.eup %1617  ;;  %v921_v26 = vxor.u32 2147483648, %v1614_v0  ;;  %v1122_v4 = vadd.s32 3, %v1118_v21  ;;  %v2676_v58 = vand.u32 2147483647, %v2288_v8 }
 0x1cc   :  { %v1322_v25 = vsel %vm1239_vm15, %v1321_v14, %v1320_v40  ;;  %v1620_v3 = vpop.eup %1619  ;;  %v711_v16 = vsel %vm709_vm12, %v1608_v2, %v710_v50  ;;  %v714_v1 = vsel %vm712_vm13, %v713_v55, %v1610_v54  ;;  %v918_v13 = vxor.u32 2147483648, %v1616_v44 }
 0x1cd   :  { %vm2558_vm2 = vcmp.le.f32.partialorder %v2676_v58, 0.7853982  ;;  %v1622_v61 = vpop.eup %1621  ;;  %vm809_vm1 = vweird.f32 %v1787_v17  ;;  %v818_v18 = vsel %vm816_vm10, %v817_v35, %v1612_v43  ;;  %v1018_v39 = vadd.s32 3, %v1014_v57 }
 0x1ce   :  { %v1325_v33 = vsel %vm2558_vm2, %v2288_v8, %v1322_v25  ;;  %v1222_v22 = vsel %vm2515_vm5, 0, %v1220_v60  ;;  %v815_v27 = vsel %vm813_vm9, %v1606_v52, %v814_v49  ;;  %vm913_vm3 = vweird.f32 %v1824_v62 }
 0x1cf   :  { %1629 = vcosq.f32 %v1325_v33  ;;  %vm920_vm4 = vcmp.eq.s32.totalorder %v915_v53, 2  ;;  %v1324_v32 = vsel %vm1239_vm15, %v1323_v24, %v2418_v59  ;;  %v1624_v34 = vpop.eup %1623  ;;  %v715_v12 = vsel %vm708_vm11, %v711_v16, %v714_v1 }
 0x1d0   :  { %1631 = vsinq.f32 %v1325_v33  ;;  %vm917_vm6 = vcmp.eq.s32.totalorder %v915_v53, 0  ;;  %v922_v20 = vsel %vm920_vm4, %v921_v26, %v1616_v44  ;;  %v1123_v29 = vand.u32 3, %v1122_v4 }
 0x1d1   :  { %v919_v63 = vsel %vm917_vm6, %v1614_v0, %v918_v13  ;;  %v1226_v46 = vadd.s32 3, %v1222_v22  ;;  %v1126_v6 = vxor.u32 2147483648, %v1622_v61  ;;  %v1129_v5 = vxor.u32 2147483648, %v1620_v3  ;;  %v1626_v52 = vpop.eup %1625 }
 0x1d2   :  { %v612_v2 = vsel %vm601_vm14, nan, %v611_v51  ;;  %vm812_vm5 = vcmp.lt.s32.totalorder %v2524_v56, 2  ;;  %v1019_v15 = vand.u32 3, %v1018_v39  ;;  %v1326_v59 = vsel %vm2558_vm2, 0, %v1324_v32  ;;  %v1628_v45 = vpop.eup %1627 }
 0x1d3   :  { %v819_v38 = vsel %vm812_vm5, %v815_v27, %v818_v18  ;;  %vm916_vm7 = vcmp.lt.s32.totalorder %v915_v53, 2  ;;  %v1022_v47 = vxor.u32 2147483648, %v1624_v34  ;;  %v1025_v54 = vxor.u32 2147483648, %v1618_v42 }
 0x1d4   :  { %v716_v30 = vsel %vm705_vm0, nan, %v715_v12  ;;  %v923_v37 = vsel %vm916_vm7, %v919_v63, %v922_v20  ;;  %vm1125_vm8 = vcmp.eq.s32.totalorder %v1123_v29, 0  ;;  %vm1128_vm9 = vcmp.eq.s32.totalorder %v1123_v29, 2 }
 0x1d5   :  { %v1227_v31 = vand.u32 3, %v1226_v46  ;;  %v1127_v11 = vsel %vm1125_vm8, %v1620_v3, %v1126_v6  ;;  %v1130_v43 = vsel %vm1128_vm9, %v1129_v5, %v1622_v61  ;;  %v1330_v19 = vadd.s32 3, %v1326_v59 }
 0x1d6   :  { %vm1021_vm10 = vcmp.eq.s32.totalorder %v1019_v15, 0  ;;  %vm1024_vm11 = vcmp.eq.s32.totalorder %v1019_v15, 2  ;;  %v1230_v56 = vxor.u32 2147483648, %v1628_v45  ;;  %v1233_v41 = vxor.u32 2147483648, %v1626_v52 }
 0x1d7   :  { %v820_v10 = vsel %vm809_vm1, nan, %v819_v38  ;;  %v1023_v40 = vsel %vm1021_vm10, %v1618_v42, %v1022_v47  ;;  %v1026_v0 = vsel %vm1024_vm11, %v1025_v54, %v1624_v34  ;;  %vm1124_vm12 = vcmp.lt.s32.totalorder %v1123_v29, 2 }
 0x1d8   :  { %v1349_v51 = vcombine.low %v612_v2, %v716_v30  ;;  %v1350_v28 = vcombine.high %v612_v2, %v716_v30  ;;  %v924_v50 = vsel %vm913_vm3, nan, %v923_v37  ;;  %v1131_v55 = vsel %vm1124_vm12, %v1127_v11, %v1130_v43 }
 0x1d9   :  { %vm1020_vm13 = vcmp.lt.s32.totalorder %v1019_v15, 2  ;;  %vm1229_vm14 = vcmp.eq.s32.totalorder %v1227_v31, 0  ;;  %vm1232_vm0 = vcmp.eq.s32.totalorder %v1227_v31, 2  ;;  %v1331_v21 = vand.u32 3, %v1330_v19 }
 0x1da   :  { %v1027_v44 = vsel %vm1020_vm13, %v1023_v40, %v1026_v0  ;;  %v1231_v49 = vsel %vm1229_vm14, %v1626_v52, %v1230_v56  ;;  %v1234_v35 = vsel %vm1232_vm0, %v1233_v41, %v1628_v45  ;;  %vm1121_vm15 = vweird.f32 %v2204_v36 }
 0x1db   :  { %v1351_v53 = vcombine.low %v820_v10, %v924_v50  ;;  %v1352_v14 = vcombine.high %v820_v10, %v924_v50  ;;  %vm1017_vm2 = vweird.f32 %v1944_v48  ;;  %v1132_v57 = vsel %vm1121_vm15, nan, %v1131_v55 }
 0x1dc   :  { %v1630_v17 = vpop.eup %1629  ;;  %v1363_v62 = vrot.slane %v1349_v51, %v2436_v23  ;;  %v1370_v24 = vrot.slane %v1350_v28, %v2436_v23  ;;  %vm1228_vm1 = vcmp.lt.s32.totalorder %v1227_v31, 2  ;;  %v1028_v26 = vsel %vm1017_vm2, nan, %v1027_v44 }
 0x1dd   :  { %v1632_v60 = vpop.eup %1631  ;;  %v1337_v42 = vxor.u32 2147483648, %v1630_v17  ;;  %v1235_v4 = vsel %vm1228_vm1, %v1231_v49, %v1234_v35  ;;  %vm1336_vm3 = vcmp.eq.s32.totalorder %v1331_v21, 2  ;;  %v1353_v7 = vcombine.low %v1028_v26, %v1132_v57 }
 0x1de   :  { %v1334_v58 = vxor.u32 2147483648, %v1632_v60  ;;  %v1354_v25 = vcombine.high %v1028_v26, %v1132_v57  ;;  %vm1333_vm4 = vcmp.eq.s32.totalorder %v1331_v21, 0  ;;  %v1377_v3 = vrot.slane %v1351_v53, %v2436_v23 }
 0x1df   :  { %v1338_v36 = vsel %vm1336_vm3, %v1337_v42, %v1632_v60  ;;  %v1384_v48 = vrot.slane %v1352_v14, %v2436_v23  ;;  %vm1332_vm6 = vcmp.lt.s32.totalorder %v1331_v21, 2  ;;  %vm1225_vm5 = vweird.f32 %v2075_v9 }
 0x1e0   :  { %v1335_v16 = vsel %vm1333_vm4, %v1630_v17, %v1334_v58  ;;  %vm1329_vm7 = vweird.f32 %v2288_v8  ;;  %v1236_v13 = vsel %vm1225_vm5, nan, %v1235_v4  ;;  %v1391_v61 = vrot.slane %v1353_v7, %v2436_v23 }
 0x1e1   :  { %v1339_v1 = vsel %vm1332_vm6, %v1335_v16, %v1338_v36  ;;  %v1398_v18 = vrot.slane %v1354_v25, %v2436_v23  ;;  %v1413_v27 = vcombine.low %v1363_v62, %v1377_v3  ;;  %v1415_v32 = vcombine.low %v1370_v24, %v1384_v48 }
 0x1e2   :  { %v1340_v33 = vsel %vm1329_vm7, nan, %v1339_v1  ;;  %v1414_v20 = vcombine.high %v1363_v62, %v1377_v3  ;;  %v1416_v29 = vcombine.high %v1370_v24, %v1384_v48 }
 0x1e3   :  { %v1355_v39 = vcombine.low %v1236_v13, %v1340_v33  ;;  %v1356_v22 = vcombine.high %v1236_v13, %v1340_v33  ;;  %v1427_v6 = vrot.slane %v1413_v27, %v2436_v23  ;;  %v1434_v5 = vrot.slane %v1415_v32, %v2436_v23 }
 0x1e4   :  { %v1441_v45 = vrot.slane %v1414_v20, %v2436_v23  ;;  %v1448_v38 = vrot.slane %v1416_v29, %v2436_v23 }
 0x1e5   :  { %v1405_v34 = vrot.slane %v1355_v39, %v2436_v23  ;;  %v1412_v12 = vrot.slane %v1356_v22, %v2436_v23 }
 0x1e7   :  { %v1417_v9 = vcombine.low %v1391_v61, %v1405_v34  ;;  %v1418_v63 = vcombine.high %v1391_v61, %v1405_v34  ;;  %v1419_v8 = vcombine.low %v1398_v18, %v1412_v12  ;;  %v1420_v46 = vcombine.high %v1398_v18, %v1412_v12 }
 0x1e9   :  { %v1455_v52 = vrot.slane %v1417_v9, %v2436_v23  ;;  %v1462_v2 = vrot.slane %v1419_v8, %v2436_v23  ;;  %v1469_v15 = vrot.slane %v1418_v63, %v2436_v23  ;;  %v1476_v59 = vrot.slane %v1420_v46, %v2436_v23 }
 0x1eb   :  { %v1477_v47 = vcombine.low %v1427_v6, %v1455_v52  ;;  %v1478_v54 = vcombine.high %v1427_v6, %v1455_v52  ;;  %v1479_v30 = vcombine.low %v1434_v5, %v1462_v2  ;;  %v1480_v37 = vcombine.high %v1434_v5, %v1462_v2 }
 0x1ec   :  { %v1481_v31 = vcombine.low %v1441_v45, %v1469_v15  ;;  %v1482_v11 = vcombine.high %v1441_v45, %v1469_v15  ;;  %v1483_v43 = vcombine.low %v1448_v38, %v1476_v59  ;;  %v1484_v19 = vcombine.high %v1448_v38, %v1476_v59 }
 0x1ed   :  { %1493 = vst [vmem:[#allocation8] sm:$0xff] %v1477_v47  ;;  %1495 = vst [vmem:[#allocation8 + $0x10] sm:$0xff] %v1478_v54 }
 0x1ee   :  { %1497 = vst [vmem:[#allocation8 + $0x20] sm:$0xff] %v1479_v30  ;;  %1499 = vst [vmem:[#allocation8 + $0x30] sm:$0xff] %v1480_v37 }
 0x1ef   :  { %1494 = vst [vmem:[#allocation8 + $0x8] sm:$0xff] %v1481_v31  ;;  %1496 = vst [vmem:[#allocation8 + $0x18] sm:$0xff] %v1482_v11 }
 0x1f0   :  { %1498 = vst [vmem:[#allocation8 + $0x28] sm:$0xff] %v1483_v43  ;;  %1500 = vst [vmem:[#allocation8 + $0x38] sm:$0xff] %v1484_v19 }
 0x1f1   :  { %1505 = vsyncadd [#allocation4], 896  ;;  %s1734_s0 = smov [#allocation8]  }
 0x1f2   :  { %s1506_s2 = sshll.u32 %s1734_s0, 4  ;;  %s1507_s2 = int_to_ptr.vmem [resolvable:$true] %s1506_s2 }
 0x1f3   :  { %s1693_s4 = scalar_lea.vmem %s1507_s2, 128  ;;  %s1697_s5 = scalar_lea.vmem %s1507_s2, 1024 }
 0x1f4   :  { %p1694_p1 = scmp.ne.s32.totalorder %s1507_s2, %s1693_s4  ;;  %p1698_p2 = scmp.lt.s32.totalorder %s1507_s2, %s1507_s2 }
 0x1f5   :  { %p1699_p3 = scmp.lt.s32.totalorder %s1697_s5, %s1693_s4 }
 0x1f7   :  { %p1700_p4 = por %p1699_p3, %p1698_p2 }
 0x1f9   :  { %p1701_p5 = pnand %p1700_p4, %p1694_p1 }
 0x1fb   :  { %1704 = shalt.err (!%p1701_p5)
}
 0x1fc   :  { %s1735_s6 = smov 128   ;;  %s1736_s7 = smov 8  }
 0x1fd   :  { %1512 = dma.vmem_to_hbm [thread:$0]  %s1507_s2, 128, %s2621_s3, [#allocation4], %s1735_s6, %s1735_s6, %s1736_s7  }
 0x1fe   :  { %1717 = dma.done.wait [#allocation4], 1024  }
 0x1ff   :  { %1718 = vsyncadd [#allocation4], 4294966272 }
 0x200   :  { %1516 = vsyncpa [#allocation3], 1 }
 0x201   :  { %1517 = vsyncpa [#allocation6], 1 }
 0x202   :  { %1518 = vsyncpa [#allocation4], 1 }

</bundles_post_ra>
